<compile_context>
chip_gen: v7x
topology: tpu7x:2x2x1
jax: 0.10.0
libtpu: 0.0.40
codegen_flags: <defaults>
</compile_context>

<pallas_src>
import numpy as np
import jax
import jax.numpy as jnp
from jax.experimental import pallas as pl
from jax.experimental.pallas import tpu as pltpu

# Small, TPU-friendly toy shapes consistent with the module's forward.
B, S, V, H = 2, 8, 128, 32
NUM_MODELS = 3                  # current / old / ref
TOKEN_TILE = 128                # MXU row tile (128 on v5e; 256 on v6e/v7x)
V_TILE_CAP = 512                # per-step vocab lane width (fits v7x 64 MiB VMEM)
OUT_LANES = 128                 # lane-dense output width (full vreg lane row)


def _round_up(x, m):
    return (x + m - 1) // m * m


# ---------------------------------------------------------------------------
# Fused kernel: head matmul + online logsumexp + token gather + GRPO epilogue
# ---------------------------------------------------------------------------
def _fused_grpo_kernel(scalars_ref, ids_ref, adv_ref, mask_ref, valid_ref, seg_ref,
                       hid_ref, head_ref, bias_ref,
                       out_ref,
                       m_acc, l_acc, g_acc, logp_acc):
    midx = pl.program_id(0)            # model index (0=curr, 1=old, 2=ref)
    kidx = pl.program_id(1)            # vocab tile index
    last_m = pl.num_programs(0) - 1
    last_k = pl.num_programs(1) - 1

    # ---- init per-model online-logsumexp accumulators ----------------------
    @pl.when(kidx == 0)
    def _():
        m_acc[...] = jnp.full(m_acc.shape, -jnp.inf, jnp.float32)
        l_acc[...] = jnp.zeros(l_acc.shape, jnp.float32)
        g_acc[...] = jnp.zeros(g_acc.shape, jnp.float32)

    # ---- fused head projection on the MXU (bf16 in, f32 accumulate) --------
    hidden = hid_ref[0]                                  # (T_PAD, H)     bf16
    head = head_ref[0, 0]                                # (H, V_TILE)    bf16
    bias = bias_ref[0, 0]                                # (1, V_TILE)    f32
    logits = jnp.dot(hidden, head,
                     preferred_element_type=jnp.float32) + bias   # (T_PAD, Vt)
    v_tile = logits.shape[-1]

    # ---- online logsumexp over vocab tiles ----------------------------------
    # NOTE: V is not padded here; if it ever is, pad the bias with a large
    # negative *finite* value (not -inf) to keep exp(m - new_max) NaN-free.
    tile_max = jnp.max(logits, axis=-1, keepdims=True)             # (T_PAD, 1)
    new_max = jnp.maximum(m_acc[...], tile_max)
    l_acc[...] = (l_acc[...] * jnp.exp(m_acc[...] - new_max)
                  + jnp.sum(jnp.exp(logits - new_max), axis=-1, keepdims=True))

    # gather logits[t, ids[t]] via select-and-sum (no int->f32 cast, no extra
    # (T, Vt) multiply temporary); only the tile holding the id contributes.
    ids = ids_ref[...]                                             # (T_PAD, 1)
    vocab_iota = (jax.lax.broadcasted_iota(jnp.int32, logits.shape, 1)
                  + kidx * v_tile)
    g_acc[...] = g_acc[...] + jnp.sum(
        jnp.where(vocab_iota == ids, logits, 0.0), axis=-1, keepdims=True)
    m_acc[...] = new_max

    # ---- finalize this model's token log-probs ------------------------------
    @pl.when(kidx == last_k)
    def _():
        # TODO(synk): at production T, re-lay logp lane-major (e.g. (B, S_pad))
        # here so the epilogue uses full-width VPU lanes instead of (T,1).
        logp_acc[midx] = g_acc[...] - (m_acc[...] + jnp.log(l_acc[...]))

    # ---- GRPO epilogue, fused on the very last grid step --------------------
    # TODO(synk): on v7x (2 TensorCores), write logp to a lane-dense output,
    # mark the model axis "parallel", and run this tiny epilogue as a separate
    # micro-call so the three matmul passes shard across both cores.
    @pl.when(jnp.logical_and(midx == last_m, kidx == last_k))
    def _():
        eps = scalars_ref[0]           # effective clip epsilon
        beta = scalars_ref[1]          # KL penalty weight
        curr = logp_acc[0]             # (T_PAD, 1)
        old = logp_acc[1]
        refl = logp_acc[2]
        adv = adv_ref[...]             # (T_PAD, 1)
        mask = mask_ref[...]           # (T_PAD, 1)  attention mask (padded rows 0)
        valid = valid_ref[...]         # (T_PAD, 1)  1 for real tokens only
        seg = seg_ref[...]             # (T_PAD, B)  constant segment matrix
        nseq = seg.shape[-1]

        ratio = jnp.exp(curr - old)
        clipped = jnp.clip(ratio, 1.0 - eps, 1.0 + eps)
        diff = refl - curr             # bounded by ~log V here; torch does not
        kl = jnp.exp(diff) - diff - 1.0    # clamp, so neither do we (parity)
        adv_loss = jnp.minimum(ratio * adv, clipped * adv)
        per_token = -(adv_loss - beta * kl)                        # (T_PAD, 1)

        # masked per-sequence mean via the wrapper-built segment matrix
        num = jnp.sum(per_token * mask * seg, axis=0, keepdims=True)      # (1,B)
        lengths = jnp.maximum(jnp.sum(mask * seg, axis=0, keepdims=True), 1.0)
        loss_per_seq = num * pl.reciprocal(lengths, approx=False)
        loss_mean = jnp.sum(loss_per_seq, axis=1, keepdims=True) * (1.0 / nseq)

        # clip-fraction numerator — torch semantics: unmasked mean over all
        # real B*S tokens (padding rows excluded via `valid`).
        clip_ind = (jnp.abs(ratio - clipped) > 1e-6).astype(jnp.float32)
        clip_cnt = jnp.sum(clip_ind * valid, keepdims=True)               # (1,1)

        # lane-dense (1, 128) output: lane 0 = mean loss, lane 1 = clip count
        lane = jax.lax.broadcasted_iota(jnp.int32, out_ref.shape, 1)
        out = jnp.where(lane == 0, loss_mean, 0.0)
        out = jnp.where(lane == 1, clip_cnt, out)
        out_ref[...] = out


def _vmem_limit_bytes(t_pad, h, v_tile, num_models):
    """Explicit scoped-VMEM budget (review item 1): 2x-buffered streamed blocks
    + f32 logits temporaries + lane-padded per-token scratch, ~50% headroom.
    Floored at 16 MiB (v5e default) and capped at 100 MiB; on v7x shrink
    V_TILE_CAP so this stays well under the 64 MiB physical budget."""
    head_blk = 2 * h * v_tile * 2                   # bf16 weight tile, 2x buffered
    bias_blk = 2 * v_tile * 4
    hid_blk = 2 * t_pad * h * 2
    logits_tmp = 3 * t_pad * v_tile * 4             # logits / exp / where temps
    token_in = 2 * 4 * t_pad * 128 * 4              # ids/adv/mask/valid (lane-padded)
    seg_in = 2 * t_pad * 128 * 4
    scratch = (3 + num_models) * t_pad * 128 * 4    # (T,1) accs pad to (T,128)
    out_blk = 2 * OUT_LANES * 4
    total = (head_blk + bias_blk + hid_blk + logits_tmp
             + token_in + seg_in + scratch + out_blk)
    total = int(total * 1.5) + (1 << 20)
    return max(16 << 20, min(total, 100 << 20))


def fused_grpo_forward(hid, head, bias, ids, adv, mask, valid, seg, eps_eff, beta):
    """hid (3,T_PAD,H) bf16, head (3,NUM_VT,H,V_TILE) bf16,
    bias (3,NUM_VT,1,V_TILE) f32, per-token vectors (T_PAD,1), seg (T_PAD,B).
    Returns (mean loss, clipped-token count)."""
    num_models, t_pad, h = hid.shape
    _, num_vt, _, v_tile = head.shape
    nseq = seg.shape[1]
    scalars = jnp.stack([jnp.asarray(eps_eff, jnp.float32),
                         jnp.asarray(beta, jnp.float32)])

    out = pl.pallas_call(
        _fused_grpo_kernel,
        out_shape=jax.ShapeDtypeStruct((1, OUT_LANES), jnp.float32),
        grid_spec=pltpu.PrefetchScalarGridSpec(
            num_scalar_prefetch=0,
            grid=(num_models, num_vt),
            in_specs=[
                pl.BlockSpec(memory_space=pltpu.MemorySpace.SMEM),       # eps/beta
                pl.BlockSpec((t_pad, 1), lambda m, k: (0, 0)),           # token ids
                pl.BlockSpec((t_pad, 1), lambda m, k: (0, 0)),           # advantages
                pl.BlockSpec((t_pad, 1), lambda m, k: (0, 0)),           # attn mask
                pl.BlockSpec((t_pad, 1), lambda m, k: (0, 0)),           # valid mask
                pl.BlockSpec((t_pad, nseq), lambda m, k: (0, 0)),        # seg matrix
                pl.BlockSpec((1, t_pad, h), lambda m, k: (m, 0, 0)),     # hidden
                # contiguous pre-tiled weight slab per (model, vocab-tile) step.
                # TODO(synk): on v5e/v6e add pipeline_mode=pl.Buffered(3) here at
                # production sizes (skip on v7x: 64 MiB VMEM budget).
                pl.BlockSpec((1, 1, h, v_tile), lambda m, k: (m, k, 0, 0)),
                pl.BlockSpec((1, 1, 1, v_tile), lambda m, k: (m, k, 0, 0)),
            ],
            out_specs=pl.BlockSpec((1, OUT_LANES), lambda m, k: (0, 0)),
            scratch_shapes=[
                pltpu.VMEM((t_pad, 1), jnp.float32),               # running max
                pltpu.VMEM((t_pad, 1), jnp.float32),               # running sum-exp
                pltpu.VMEM((t_pad, 1), jnp.float32),               # gathered logit
                pltpu.VMEM((num_models, t_pad, 1), jnp.float32),   # per-model logp
            ]),
        compiler_params=pltpu.CompilerParams(
            # Models axis is sequential: the fused epilogue reads all three
            # logp vectors from VMEM scratch (single launch; best on 1-TC
            # v5e/v6e).  See the v7x megacore TODO in the kernel body.
            dimension_semantics=("arbitrary", "arbitrary"),
            vmem_limit_bytes=_vmem_limit_bytes(t_pad, h, v_tile, num_models)),
    )(scalars, ids, adv, mask, valid, seg, hid, head, bias)
    return out[0, 0], out[0, 1]


# ---------------------------------------------------------------------------
# Synthetic "model" params: embedding table + linear head
# ---------------------------------------------------------------------------
def make_model_params(key):
    k1, k2 = jax.random.split(key)
    embed = 0.02 * jax.random.normal(k1, (V, H), dtype=jnp.float32)
    head = 0.02 * jax.random.normal(k2, (H, V), dtype=jnp.float32)
    bias = jnp.zeros((V,), dtype=jnp.float32)
    return embed, head, bias


def stack_model_inputs(params_list, input_ids):
    """Embedding lookup (tiny, left to XLA) + stack the three models so one
    pallas_call processes them over a leading grid axis.  Tokens are padded to
    a multiple of TOKEN_TILE (MXU row tile); the head is pre-tiled so each
    per-step weight DMA is one contiguous slab."""
    flat_ids = input_ids.reshape(-1)
    t = flat_ids.shape[0]
    t_pad = _round_up(t, TOKEN_TILE)
    hid = jnp.stack([jnp.take(p[0], flat_ids, axis=0) for p in params_list])
    hid = jnp.pad(hid, ((0, 0), (0, t_pad - t), (0, 0)))                 # (3,T_PAD,H)

    h, v = params_list[0][1].shape
    v_tile = min(v, V_TILE_CAP)
    assert v % v_tile == 0
    num_vt = v // v_tile
    head = jnp.stack([p[1].reshape(h, num_vt, v_tile).transpose(1, 0, 2)
                      for p in params_list])                             # (3,NUM_VT,H,Vt)
    bias = jnp.stack([p[2].reshape(num_vt, 1, v_tile) for p in params_list])
    # bf16 only at the MXU inputs; post-matmul math in the kernel stays f32.
    return hid.astype(jnp.bfloat16), head.astype(jnp.bfloat16), bias.astype(jnp.float32)


def make_token_inputs(input_ids, attention_mask, advantages):
    """Flatten + pad per-token vectors; build the constant (T_PAD, B) segment
    matrix (replaces the in-kernel iota//S one-hot) and the valid-token mask
    (torch clip-fraction counts every real B*S token, masked or not)."""
    b, s = input_ids.shape
    t = b * s
    t_pad = _round_up(t, TOKEN_TILE)
    pad = ((0, t_pad - t), (0, 0))
    ids = jnp.pad(input_ids.reshape(t, 1).astype(jnp.int32), pad)
    adv = jnp.pad(advantages.reshape(t, 1).astype(jnp.float32), pad)
    mask = jnp.pad(attention_mask.reshape(t, 1).astype(jnp.float32), pad)
    tok = jnp.arange(t_pad)
    valid = (tok < t).astype(jnp.float32).reshape(t_pad, 1)
    seg = (((tok[:, None] // s) == jnp.arange(b)[None, :])
           & (tok[:, None] < t)).astype(jnp.float32)                     # (T_PAD, B)
    return ids, adv, mask, valid, seg


# ---------------------------------------------------------------------------
# EnhancedGRPOLoss wrapper (mirrors the PyTorch module semantics)
# ---------------------------------------------------------------------------
class EnhancedGRPOLoss:
    """kl_weight is stored but (matching the PyTorch spec) never enters the
    loss — only beta does."""

    def __init__(self, clip_eps=0.2, kl_weight=0.1, beta=1.0,
                 use_adaptive_clipping=True):
        self.clip_eps = clip_eps
        self.kl_weight = kl_weight
        self.beta = beta
        self.use_adaptive_clipping = use_adaptive_clipping
        # Device scalar, updated with jnp.where -> no blocking host sync.
        self.adaptive_clip_factor = jnp.asarray(1.0, jnp.float32)

    def __call__(self, current_params, old_params, ref_params,
                 input_ids, attention_mask, advantages):
        hid, head, bias = stack_model_inputs(
            [current_params, old_params, ref_params], input_ids)
        ids, adv, mask, valid, seg = make_token_inputs(
            input_ids, attention_mask, advantages)

        eps_eff = jnp.asarray(self.clip_eps, jnp.float32)
        if self.use_adaptive_clipping:
            eps_eff = eps_eff * self.adaptive_clip_factor

        loss, clip_cnt = fused_grpo_forward(hid, head, bias, ids, adv, mask,
                                            valid, seg, eps_eff, self.beta)

        if self.use_adaptive_clipping:
            # Torch semantics: clip fraction over all real B*S tokens (unmasked).
            clip_fraction = clip_cnt / float(input_ids.size)
            factor = self.adaptive_clip_factor
            factor = jnp.where(clip_fraction > 0.3, factor * 0.9,
                               jnp.where(clip_fraction < 0.1, factor * 1.1,
                                         factor))
            self.adaptive_clip_factor = jnp.clip(factor, 0.1, 2.0)

        return loss


# ---------------------------------------------------------------------------
# Pure-JAX reference (same bf16 head-matmul inputs) for sanity checking
# ---------------------------------------------------------------------------
def reference_loss(current_params, old_params, ref_params,
                   input_ids, attention_mask, advantages,
                   clip_eps=0.2, beta=1.0):
    def tlp(params):
        embed, head, bias = params
        hid = jnp.take(embed, input_ids, axis=0).astype(jnp.bfloat16).astype(jnp.float32)
        w = head.astype(jnp.bfloat16).astype(jnp.float32)
        logits = jnp.einsum("bsh,hv->bsv", hid, w,
                            preferred_element_type=jnp.float32) + bias
        logp = jax.nn.log_softmax(logits, axis=-1)
        return jnp.take_along_axis(logp, input_ids[..., None], axis=-1)[..., 0]

    curr_logp, old_logp, ref_logp = (tlp(current_params), tlp(old_params),
                                     tlp(ref_params))
    ratio = jnp.exp(curr_logp - old_logp)
    clipped = jnp.clip(ratio, 1.0 - clip_eps, 1.0 + clip_eps)
    diff = ref_logp - curr_logp
    kl = jnp.exp(diff) - diff - 1.0
    adv_loss = jnp.minimum(ratio * advantages, clipped * advantages)
    per_token = -(adv_loss - beta * kl)
    mask = attention_mask.astype(jnp.float32)
    lengths = jnp.maximum(mask.sum(axis=1), 1.0)
    loss_per_seq = (per_token * mask).sum(axis=1) / lengths
    return loss_per_seq.mean()


if __name__ == "__main__":
    key = jax.random.PRNGKey(0)
    k_cur, k_old, k_ref, k_ids, k_adv = jax.random.split(key, 5)

    current_params = make_model_params(k_cur)
    old_params = make_model_params(k_old)
    ref_params = make_model_params(k_ref)

    input_ids = jax.random.randint(k_ids, (B, S), 0, V, dtype=jnp.int32)
    attention_mask = jnp.array(
        [[1, 1, 1, 1, 1, 1, 1, 1],
         [1, 1, 1, 1, 1, 0, 0, 0]], dtype=jnp.float32)
    advantages = jax.random.normal(k_adv, (B, S), dtype=jnp.float32)

    loss_fn = EnhancedGRPOLoss(clip_eps=0.2, kl_weight=0.1, beta=1.0,
                               use_adaptive_clipping=True)
    loss = loss_fn(current_params, old_params, ref_params,
                   input_ids, attention_mask, advantages)
    jax.block_until_ready(loss)

    ref = reference_loss(current_params, old_params, ref_params,
                         input_ids, attention_mask, advantages)
    np.testing.assert_allclose(np.asarray(loss), np.asarray(ref),
                               rtol=1e-4, atol=1e-5)

    print("KERNEL_OK")
</pallas_src>

<mosaic_0001>
module attributes {stable_mosaic.version = 11 : i64} {
  func.func @_fused_grpo_kernel(%arg0: i32, %arg1: i32, %arg2: memref<2xf32, #tpu.memory_space<smem>>, %arg3: memref<128x1xi32, #tpu.memory_space<vmem>>, %arg4: memref<128x1xf32, #tpu.memory_space<vmem>>, %arg5: memref<128x1xf32, #tpu.memory_space<vmem>>, %arg6: memref<128x1xf32, #tpu.memory_space<vmem>>, %arg7: memref<128x2xf32, #tpu.memory_space<vmem>>, %arg8: memref<1x128x32xbf16, #tpu.memory_space<vmem>>, %arg9: memref<1x1x32x128xbf16, #tpu.memory_space<vmem>>, %arg10: memref<1x1x1x128xf32, #tpu.memory_space<vmem>>, %arg11: memref<1x128xf32, #tpu.memory_space<vmem>>, %arg12: memref<128x1xf32, #tpu.memory_space<vmem>>, %arg13: memref<128x1xf32, #tpu.memory_space<vmem>>, %arg14: memref<128x1xf32, #tpu.memory_space<vmem>>, %arg15: memref<3x128x1xf32, #tpu.memory_space<vmem>>) attributes {dimension_semantics = [#tpu.dimension_semantics<arbitrary>, #tpu.dimension_semantics<arbitrary>], iteration_bounds = array<i64: 3, 1>, scalar_prefetch = 0 : i64, scratch_operands = 4 : i64, tpu.core_type = #tpu.core_type<tc>, window_params = [{transform_indices = @transform_0, window_bounds = array<i64: 2>}, {pipeline_mode = #tpu.pipeline_mode<synchronous>, transform_indices = @transform_1, window_bounds = array<i64: 128, 1>}, {pipeline_mode = #tpu.pipeline_mode<synchronous>, transform_indices = @transform_2, window_bounds = array<i64: 128, 1>}, {pipeline_mode = #tpu.pipeline_mode<synchronous>, transform_indices = @transform_3, window_bounds = array<i64: 128, 1>}, {pipeline_mode = #tpu.pipeline_mode<synchronous>, transform_indices = @transform_4, window_bounds = array<i64: 128, 1>}, {pipeline_mode = #tpu.pipeline_mode<synchronous>, transform_indices = @transform_5, window_bounds = array<i64: 128, 2>}, {transform_indices = @transform_6, window_bounds = array<i64: 1, 128, 32>}, {transform_indices = @transform_7, window_bounds = array<i64: 1, 1, 32, 128>}, {transform_indices = @transform_8, window_bounds = array<i64: 1, 1, 1, 128>}, {pipeline_mode = #tpu.pipeline_mode<synchronous>, transform_indices = @transform_9, window_bounds = array<i64: 1, 128>}]} {
    %c0_i32 = arith.constant 0 : i32
    %0 = arith.cmpi eq, %arg1, %c0_i32 : i32
    %1 = arith.extui %0 : i1 to i32
    %c0_i32_0 = arith.constant 0 : i32
    %2 = arith.cmpi ne, %1, %c0_i32_0 : i32
    scf.if %2 {
      %cst_35 = arith.constant 0xFF800000 : f32
      %51 = vector.broadcast %cst_35 : f32 to vector<128x1xf32>
      %c0_36 = arith.constant 0 : index
      %c0_37 = arith.constant 0 : index
      %52 = vector.load %arg12[%c0_36, %c0_37] : memref<128x1xf32, #tpu.memory_space<vmem>>, vector<128x1xf32>
      tpu.vector_store %arg12[%c0_36, %c0_37], %51 {strides = array<i32>} : memref<128x1xf32, #tpu.memory_space<vmem>>, vector<128x1xf32>,
      %cst_38 = arith.constant 0.000000e+00 : f32
      %53 = vector.broadcast %cst_38 : f32 to vector<128x1xf32>
      %c0_39 = arith.constant 0 : index
      %c0_40 = arith.constant 0 : index
      %54 = vector.load %arg13[%c0_39, %c0_40] : memref<128x1xf32, #tpu.memory_space<vmem>>, vector<128x1xf32>
      tpu.vector_store %arg13[%c0_39, %c0_40], %53 {strides = array<i32>} : memref<128x1xf32, #tpu.memory_space<vmem>>, vector<128x1xf32>,
      %cst_41 = arith.constant 0.000000e+00 : f32
      %55 = vector.broadcast %cst_41 : f32 to vector<128x1xf32>
      %c0_42 = arith.constant 0 : index
      %c0_43 = arith.constant 0 : index
      %56 = vector.load %arg14[%c0_42, %c0_43] : memref<128x1xf32, #tpu.memory_space<vmem>>, vector<128x1xf32>
      tpu.vector_store %arg14[%c0_42, %c0_43], %55 {strides = array<i32>} : memref<128x1xf32, #tpu.memory_space<vmem>>, vector<128x1xf32>,
    } else {
    }
    %c0 = arith.constant 0 : index
    %c0_1 = arith.constant 0 : index
    %c0_2 = arith.constant 0 : index
    %3 = vector.load %arg8[%c0, %c0_1, %c0_2] : memref<1x128x32xbf16, #tpu.memory_space<vmem>>, vector<1x128x32xbf16>
    %4 = vector.shape_cast %3 : vector<1x128x32xbf16> to vector<128x32xbf16>
    %c0_3 = arith.constant 0 : index
    %c0_4 = arith.constant 0 : index
    %c0_5 = arith.constant 0 : index
    %c0_6 = arith.constant 0 : index
    %5 = vector.load %arg9[%c0_3, %c0_4, %c0_5, %c0_6] : memref<1x1x32x128xbf16, #tpu.memory_space<vmem>>, vector<1x1x32x128xbf16>
    %6 = vector.shape_cast %5 : vector<1x1x32x128xbf16> to vector<32x128xbf16>
    %c0_7 = arith.constant 0 : index
    %c0_8 = arith.constant 0 : index
    %c0_9 = arith.constant 0 : index
    %c0_10 = arith.constant 0 : index
    %7 = vector.load %arg10[%c0_7, %c0_8, %c0_9, %c0_10] : memref<1x1x1x128xf32, #tpu.memory_space<vmem>>, vector<1x1x1x128xf32>
    %8 = vector.shape_cast %7 : vector<1x1x1x128xf32> to vector<1x128xf32>
    %cst = arith.constant dense<0.000000e+00> : vector<128x128xf32>
    %9 = tpu.matmul %4, %6, %cst {dimension_numbers = #tpu.dot_dimension_numbers<[1], [0], [0], [1], [0, 0, 1, 1], [], []>} : vector<128x32xbf16>, vector<32x128xbf16>, vector<128x128xf32> -> vector<128x128xf32>
    %10 = vector.broadcast %8 : vector<1x128xf32> to vector<128x128xf32>
    %11 = arith.addf %9, %10 : vector<128x128xf32>
    %cst_11 = arith.constant dense<0xFF800000> : vector<128xf32>
    %12 = vector.multi_reduction <maximumf>, %11, %cst_11 [1] : vector<128x128xf32> to vector<128xf32>
    %13 = vector.shape_cast %12 : vector<128xf32> to vector<128x1xf32>
    %c0_12 = arith.constant 0 : index
    %c0_13 = arith.constant 0 : index
    %14 = vector.load %arg12[%c0_12, %c0_13] : memref<128x1xf32, #tpu.memory_space<vmem>>, vector<128x1xf32>
    %15 = arith.maximumf %14, %13 : vector<128x1xf32>
    %c0_14 = arith.constant 0 : index
    %c0_15 = arith.constant 0 : index
    %16 = vector.load %arg13[%c0_14, %c0_15] : memref<128x1xf32, #tpu.memory_space<vmem>>, vector<128x1xf32>
    %c0_16 = arith.constant 0 : index
    %c0_17 = arith.constant 0 : index
    %17 = vector.load %arg12[%c0_16, %c0_17] : memref<128x1xf32, #tpu.memory_space<vmem>>, vector<128x1xf32>
    %18 = arith.subf %17, %15 : vector<128x1xf32>
    %19 = math.exp %18 : vector<128x1xf32>
    %20 = arith.mulf %16, %19 : vector<128x1xf32>
    %21 = vector.broadcast %15 : vector<128x1xf32> to vector<128x128xf32>
    %22 = arith.subf %11, %21 : vector<128x128xf32>
    %23 = math.exp %22 : vector<128x128xf32>
    %cst_18 = arith.constant dense<0.000000e+00> : vector<128xf32>
    %24 = vector.multi_reduction <add>, %23, %cst_18 [1] : vector<128x128xf32> to vector<128xf32>
    %25 = vector.shape_cast %24 : vector<128xf32> to vector<128x1xf32>
    %26 = arith.addf %20, %25 : vector<128x1xf32>
    %c0_19 = arith.constant 0 : index
    %c0_20 = arith.constant 0 : index
    %27 = vector.load %arg13[%c0_19, %c0_20] : memref<128x1xf32, #tpu.memory_space<vmem>>, vector<128x1xf32>
    tpu.vector_store %arg13[%c0_19, %c0_20], %26 {strides = array<i32>} : memref<128x1xf32, #tpu.memory_space<vmem>>, vector<128x1xf32>,
    %c0_21 = arith.constant 0 : index
    %c0_22 = arith.constant 0 : index
    %28 = vector.load %arg3[%c0_21, %c0_22] : memref<128x1xi32, #tpu.memory_space<vmem>>, vector<128x1xi32>
    %29 = tpu.iota {dimensions = array<i32: 1>} : vector<128x128xi32>
    %c128_i32 = arith.constant 128 : i32
    %30 = arith.muli %arg1, %c128_i32 : i32
    %31 = vector.broadcast %30 : i32 to vector<128x128xi32>
    %32 = arith.addi %29, %31 : vector<128x128xi32>
    %c0_23 = arith.constant 0 : index
    %c0_24 = arith.constant 0 : index
    %33 = vector.load %arg14[%c0_23, %c0_24] : memref<128x1xf32, #tpu.memory_space<vmem>>, vector<128x1xf32>
    %34 = vector.broadcast %28 : vector<128x1xi32> to vector<128x128xi32>
    %35 = arith.cmpi eq, %32, %34 : vector<128x128xi32>
    %cst_25 = arith.constant 0.000000e+00 : f32
    %36 = vector.broadcast %cst_25 : f32 to vector<128x128xf32>
    %37 = arith.select %35, %11, %36 : vector<128x128xi1>, vector<128x128xf32>
    %cst_26 = arith.constant dense<0.000000e+00> : vector<128xf32>
    %38 = vector.multi_reduction <add>, %37, %cst_26 [1] : vector<128x128xf32> to vector<128xf32>
    %39 = vector.shape_cast %38 : vector<128xf32> to vector<128x1xf32>
    %40 = arith.addf %33, %39 : vector<128x1xf32>
    %c0_27 = arith.constant 0 : index
    %c0_28 = arith.constant 0 : index
    %41 = vector.load %arg14[%c0_27, %c0_28] : memref<128x1xf32, #tpu.memory_space<vmem>>, vector<128x1xf32>
    tpu.vector_store %arg14[%c0_27, %c0_28], %40 {strides = array<i32>} : memref<128x1xf32, #tpu.memory_space<vmem>>, vector<128x1xf32>,
    %c0_29 = arith.constant 0 : index
    %c0_30 = arith.constant 0 : index
    %42 = vector.load %arg12[%c0_29, %c0_30] : memref<128x1xf32, #tpu.memory_space<vmem>>, vector<128x1xf32>
    tpu.vector_store %arg12[%c0_29, %c0_30], %15 {strides = array<i32>} : memref<128x1xf32, #tpu.memory_space<vmem>>, vector<128x1xf32>,
    %c0_i32_31 = arith.constant 0 : i32
    %43 = arith.cmpi eq, %arg1, %c0_i32_31 : i32
    %44 = arith.extui %43 : i1 to i32
    %c0_i32_32 = arith.constant 0 : i32
    %45 = arith.cmpi ne, %44, %c0_i32_32 : i32
    scf.if %45 {
      %c0_35 = arith.constant 0 : index
      %c0_36 = arith.constant 0 : index
      %51 = vector.load %arg14[%c0_35, %c0_36] : memref<128x1xf32, #tpu.memory_space<vmem>>, vector<128x1xf32>
      %c0_37 = arith.constant 0 : index
      %c0_38 = arith.constant 0 : index
      %52 = vector.load %arg12[%c0_37, %c0_38] : memref<128x1xf32, #tpu.memory_space<vmem>>, vector<128x1xf32>
      %c0_39 = arith.constant 0 : index
      %c0_40 = arith.constant 0 : index
      %53 = vector.load %arg13[%c0_39, %c0_40] : memref<128x1xf32, #tpu.memory_space<vmem>>, vector<128x1xf32>
      %54 = math.log %53 : vector<128x1xf32>
      %55 = arith.addf %52, %54 : vector<128x1xf32>
      %56 = arith.subf %51, %55 : vector<128x1xf32>
      %57 = arith.index_cast %arg0 : i32 to index
      %c0_41 = arith.constant 0 : index
      %c0_42 = arith.constant 0 : index
      %58 = vector.load %arg15[%57, %c0_41, %c0_42] : memref<3x128x1xf32, #tpu.memory_space<vmem>>, vector<1x128x1xf32>
      %59 = vector.shape_cast %58 : vector<1x128x1xf32> to vector<128x1xf32>
      %60 = vector.shape_cast %56 : vector<128x1xf32> to vector<1x128x1xf32>
      tpu.vector_store %arg15[%57, %c0_41, %c0_42], %60 {strides = array<i32>} : memref<3x128x1xf32, #tpu.memory_space<vmem>>, vector<1x128x1xf32>,
    } else {
    }
    %c2_i32 = arith.constant 2 : i32
    %46 = arith.cmpi eq, %arg0, %c2_i32 : i32
    %c0_i32_33 = arith.constant 0 : i32
    %47 = arith.cmpi eq, %arg1, %c0_i32_33 : i32
    %48 = arith.andi %46, %47 : i1
    %49 = arith.extui %48 : i1 to i32
    %c0_i32_34 = arith.constant 0 : i32
    %50 = arith.cmpi ne, %49, %c0_i32_34 : i32
    scf.if %50 {
      %c0_35 = arith.constant 0 : index
      %51 = memref.load %arg2[%c0_35] : memref<2xf32, #tpu.memory_space<smem>>
      %c1 = arith.constant 1 : index
      %52 = memref.load %arg2[%c1] : memref<2xf32, #tpu.memory_space<smem>>
      %c0_36 = arith.constant 0 : index
      %c0_37 = arith.constant 0 : index
      %c0_38 = arith.constant 0 : index
      %53 = vector.load %arg15[%c0_36, %c0_37, %c0_38] : memref<3x128x1xf32, #tpu.memory_space<vmem>>, vector<1x128x1xf32>
      %54 = vector.shape_cast %53 : vector<1x128x1xf32> to vector<128x1xf32>
      %c1_39 = arith.constant 1 : index
      %c0_40 = arith.constant 0 : index
      %c0_41 = arith.constant 0 : index
      %55 = vector.load %arg15[%c1_39, %c0_40, %c0_41] : memref<3x128x1xf32, #tpu.memory_space<vmem>>, vector<1x128x1xf32>
      %56 = vector.shape_cast %55 : vector<1x128x1xf32> to vector<128x1xf32>
      %c2 = arith.constant 2 : index
      %c0_42 = arith.constant 0 : index
      %c0_43 = arith.constant 0 : index
      %57 = vector.load %arg15[%c2, %c0_42, %c0_43] : memref<3x128x1xf32, #tpu.memory_space<vmem>>, vector<1x128x1xf32>
      %58 = vector.shape_cast %57 : vector<1x128x1xf32> to vector<128x1xf32>
      %c0_44 = arith.constant 0 : index
      %c0_45 = arith.constant 0 : index
      %59 = vector.load %arg4[%c0_44, %c0_45] : memref<128x1xf32, #tpu.memory_space<vmem>>, vector<128x1xf32>
      %c0_46 = arith.constant 0 : index
      %c0_47 = arith.constant 0 : index
      %60 = vector.load %arg5[%c0_46, %c0_47] : memref<128x1xf32, #tpu.memory_space<vmem>>, vector<128x1xf32>
      %c0_48 = arith.constant 0 : index
      %c0_49 = arith.constant 0 : index
      %61 = vector.load %arg6[%c0_48, %c0_49] : memref<128x1xf32, #tpu.memory_space<vmem>>, vector<128x1xf32>
      %c0_50 = arith.constant 0 : index
      %c0_51 = arith.constant 0 : index
      %62 = vector.load %arg7[%c0_50, %c0_51] : memref<128x2xf32, #tpu.memory_space<vmem>>, vector<128x2xf32>
      %63 = arith.subf %54, %56 : vector<128x1xf32>
      %64 = math.exp %63 : vector<128x1xf32>
      %cst_52 = arith.constant 1.000000e+00 : f32
      %65 = arith.subf %cst_52, %51 : f32
      %cst_53 = arith.constant 1.000000e+00 : f32
      %66 = arith.addf %cst_53, %51 : f32
      %67 = vector.broadcast %65 : f32 to vector<128x1xf32>
      %68 = arith.maximumf %67, %64 : vector<128x1xf32>
      %69 = vector.broadcast %66 : f32 to vector<128x1xf32>
      %70 = arith.minimumf %69, %68 : vector<128x1xf32>
      %71 = arith.subf %58, %54 : vector<128x1xf32>
      %72 = math.exp %71 : vector<128x1xf32>
      %73 = arith.subf %72, %71 : vector<128x1xf32>
      %cst_54 = arith.constant 1.000000e+00 : f32
      %74 = vector.broadcast %cst_54 : f32 to vector<128x1xf32>
      %75 = arith.subf %73, %74 : vector<128x1xf32>
      %76 = arith.mulf %64, %59 : vector<128x1xf32>
      %77 = arith.mulf %70, %59 : vector<128x1xf32>
      %78 = arith.minimumf %76, %77 : vector<128x1xf32>
      %79 = vector.broadcast %52 : f32 to vector<128x1xf32>
      %80 = arith.mulf %79, %75 : vector<128x1xf32>
      %81 = arith.subf %78, %80 : vector<128x1xf32>
      %cst_55 = arith.constant 0.000000e+00 : f32
      %82 = vector.broadcast %cst_55 : f32 to vector<128x1xf32>
      %83 = arith.subf %82, %81 : vector<128x1xf32>
      %84 = arith.mulf %83, %60 : vector<128x1xf32>
      %85 = vector.broadcast %84 : vector<128x1xf32> to vector<128x2xf32>
      %86 = arith.mulf %85, %62 : vector<128x2xf32>
      %cst_56 = arith.constant dense<0.000000e+00> : vector<2xf32>
      %87 = vector.multi_reduction <add>, %86, %cst_56 [0] : vector<128x2xf32> to vector<2xf32>
      %88 = vector.shape_cast %87 : vector<2xf32> to vector<1x2xf32>
      %89 = vector.broadcast %60 : vector<128x1xf32> to vector<128x2xf32>
      %90 = arith.mulf %89, %62 : vector<128x2xf32>
      %cst_57 = arith.constant dense<0.000000e+00> : vector<2xf32>
      %91 = vector.multi_reduction <add>, %90, %cst_57 [0] : vector<128x2xf32> to vector<2xf32>
      %92 = vector.shape_cast %91 : vector<2xf32> to vector<1x2xf32>
      %cst_58 = arith.constant 1.000000e+00 : f32
      %93 = vector.broadcast %cst_58 : f32 to vector<1x2xf32>
      %94 = arith.maximumf %92, %93 : vector<1x2xf32>
      %95 = tpu.reciprocal %94 : vector<1x2xf32> -> vector<1x2xf32>
      %96 = arith.mulf %88, %95 : vector<1x2xf32>
      %cst_59 = arith.constant dense<0.000000e+00> : vector<1xf32>
      %97 = vector.multi_reduction <add>, %96, %cst_59 [1] : vector<1x2xf32> to vector<1xf32>
      %98 = vector.shape_cast %97 : vector<1xf32> to vector<1x1xf32>
      %cst_60 = arith.constant 5.000000e-01 : f32
      %99 = vector.broadcast %cst_60 : f32 to vector<1x1xf32>
      %100 = arith.mulf %98, %99 : vector<1x1xf32>
      %101 = arith.subf %64, %70 : vector<128x1xf32>
      %102 = math.absf %101 : vector<128x1xf32>
      %cst_61 = arith.constant 9.99999997E-7 : f32
      %103 = vector.broadcast %cst_61 : f32 to vector<128x1xf32>
      %104 = arith.cmpf ogt, %102, %103 : vector<128x1xf32>
      %105 = arith.extui %104 : vector<128x1xi1> to vector<128x1xi32>
      %106 = arith.sitofp %105 : vector<128x1xi32> to vector<128x1xf32>
      %107 = arith.mulf %106, %61 : vector<128x1xf32>
      %108 = vector.shape_cast %107 : vector<128x1xf32> to vector<1x128x1xf32>
      %cst_62 = arith.constant dense<0.000000e+00> : vector<1xf32>
      %109 = vector.multi_reduction <add>, %108, %cst_62 [1, 2] : vector<1x128x1xf32> to vector<1xf32>
      %110 = vector.shape_cast %109 : vector<1xf32> to vector<1x1x1xf32>
      %111 = vector.extract %110[0, 0, 0] : f32 from vector<1x1x1xf32>
      %112 = vector.broadcast %111 : f32 to vector<1x1xf32>
      %113 = tpu.iota {dimensions = array<i32: 1>} : vector<1x128xi32>
      %c0_i32_63 = arith.constant 0 : i32
      %114 = vector.broadcast %c0_i32_63 : i32 to vector<1x128xi32>
      %115 = arith.cmpi eq, %113, %114 : vector<1x128xi32>
      %cst_64 = arith.constant 0.000000e+00 : f32
      %116 = vector.shape_cast %100 : vector<1x1xf32> to vector<1x1xf32>
      %117 = vector.broadcast %116 : vector<1x1xf32> to vector<1x128xf32>
      %118 = vector.broadcast %cst_64 : f32 to vector<1x128xf32>
      %119 = arith.select %115, %117, %118 : vector<1x128xi1>, vector<1x128xf32>
      %c1_i32 = arith.constant 1 : i32
      %120 = vector.broadcast %c1_i32 : i32 to vector<1x128xi32>
      %121 = arith.cmpi eq, %113, %120 : vector<1x128xi32>
      %122 = vector.shape_cast %112 : vector<1x1xf32> to vector<1x1xf32>
      %123 = vector.broadcast %122 : vector<1x1xf32> to vector<1x128xf32>
      %124 = arith.select %121, %123, %119 : vector<1x128xi1>, vector<1x128xf32>
      %c0_65 = arith.constant 0 : index
      %c0_66 = arith.constant 0 : index
      %125 = vector.load %arg11[%c0_65, %c0_66] : memref<1x128xf32, #tpu.memory_space<vmem>>, vector<1x128xf32>
      tpu.vector_store %arg11[%c0_65, %c0_66], %124 {strides = array<i32>} : memref<1x128xf32, #tpu.memory_space<vmem>>, vector<1x128xf32>,
    } else {
    }
    return
  }
  func.func @transform_0(%arg0: i32, %arg1: i32) -> i32 {
    %c0_i32 = arith.constant 0 : i32
    %c0_i32_0 = arith.constant 0 : i32
    return %c0_i32 : i32
  }
  func.func @transform_1(%arg0: i32, %arg1: i32) -> (i32, i32) {
    %c0_i32 = arith.constant 0 : i32
    %c0_i32_0 = arith.constant 0 : i32
    %c0_i32_1 = arith.constant 0 : i32
    return %c0_i32, %c0_i32_0 : i32, i32
  }
  func.func @transform_2(%arg0: i32, %arg1: i32) -> (i32, i32) {
    %c0_i32 = arith.constant 0 : i32
    %c0_i32_0 = arith.constant 0 : i32
    %c0_i32_1 = arith.constant 0 : i32
    return %c0_i32, %c0_i32_0 : i32, i32
  }
  func.func @transform_3(%arg0: i32, %arg1: i32) -> (i32, i32) {
    %c0_i32 = arith.constant 0 : i32
    %c0_i32_0 = arith.constant 0 : i32
    %c0_i32_1 = arith.constant 0 : i32
    return %c0_i32, %c0_i32_0 : i32, i32
  }
  func.func @transform_4(%arg0: i32, %arg1: i32) -> (i32, i32) {
    %c0_i32 = arith.constant 0 : i32
    %c0_i32_0 = arith.constant 0 : i32
    %c0_i32_1 = arith.constant 0 : i32
    return %c0_i32, %c0_i32_0 : i32, i32
  }
  func.func @transform_5(%arg0: i32, %arg1: i32) -> (i32, i32) {
    %c0_i32 = arith.constant 0 : i32
    %c0_i32_0 = arith.constant 0 : i32
    %c0_i32_1 = arith.constant 0 : i32
    return %c0_i32, %c0_i32_0 : i32, i32
  }
  func.func @transform_6(%arg0: i32, %arg1: i32) -> (i32, i32, i32) {
    %c0_i32 = arith.constant 0 : i32
    %c0_i32_0 = arith.constant 0 : i32
    %c0_i32_1 = arith.constant 0 : i32
    return %arg0, %c0_i32, %c0_i32_0 : i32, i32, i32
  }
  func.func @transform_7(%arg0: i32, %arg1: i32) -> (i32, i32, i32, i32) {
    %c0_i32 = arith.constant 0 : i32
    %c0_i32_0 = arith.constant 0 : i32
    %c0_i32_1 = arith.constant 0 : i32
    return %arg0, %arg1, %c0_i32, %c0_i32_0 : i32, i32, i32, i32
  }
  func.func @transform_8(%arg0: i32, %arg1: i32) -> (i32, i32, i32, i32) {
    %c0_i32 = arith.constant 0 : i32
    %c0_i32_0 = arith.constant 0 : i32
    %c0_i32_1 = arith.constant 0 : i32
    return %arg0, %arg1, %c0_i32, %c0_i32_0 : i32, i32, i32, i32
  }
  func.func @transform_9(%arg0: i32, %arg1: i32) -> (i32, i32) {
    %c0_i32 = arith.constant 0 : i32
    %c0_i32_0 = arith.constant 0 : i32
    %c0_i32_1 = arith.constant 0 : i32
    return %c0_i32, %c0_i32_0 : i32, i32
  }
}

</mosaic_0001>

<bundles_post_ra>
// kernel: tpu_custom_call.1
= control target key start
LH: loop header
LB: loop body
LE: loop exit
PB: predicated region body
PF: predicated region fallthrough
CT: control target
= control target key end

     0   :  { %14 = vsyncpa [#allocation8], 0  ;;  %s3906_s0 = inlined_call_operand.vmem [shape: f32[2], index: 0, kind: input, shape index: {}]   ;;  %s3907_s1 = inlined_call_operand.vmem [shape: s32[128,1], index: 1, kind: input, shape index: {}]   ;;  %s3908_s2 = inlined_call_operand.vmem [shape: f32[128,1], index: 2, kind: input, shape index: {}]   ;;  %s3909_s3 = inlined_call_operand.vmem [shape: f32[128,1], index: 3, kind: input, shape index: {}]   ;;  %s3910_s4 = inlined_call_operand.vmem [shape: f32[128,1], index: 4, kind: input, shape index: {}]   ;;  %s3911_s5 = inlined_call_operand.vmem [shape: f32[128,2], index: 5, kind: input, shape index: {}]   ;;  %s3912_s6 = inlined_call_operand.vmem [shape: bf16[3,128,32], index: 6, kind: input, shape index: {}]   ;;  %s3913_s7 = inlined_call_operand.vmem [shape: bf16[3,1,32,128], index: 7, kind: input, shape index: {}]   ;;  %s3914_s8 = inlined_call_operand.vmem [shape: f32[3,1,1,128], index: 8, kind: input, shape index: {}]   ;;  %s3915_s9 = inlined_call_operand.hbm [shape: f32[1,128], index: 9, kind: output, shape index: {}]  }
   0x1   :  { %15 = vsyncpa [#allocation7], 0  ;;  %s2702_s30 = smov 0   ;;  %s2704_s10 = smov 0  }
   0x2   :  { %s2706_s11 = smov 0  }
   0x3 LB: > { %s2242_s12 = sadd.s32 4294967295, %s2643_s11   ;;  %s33_s13 = sadd.s32 1, %s2639_s10  ;;  %s2643_s11 = sphi %s2706_s11, %s21_s11   ;;  %s2639_s10 = sphi %s2704_s10, %s3953_s10   ;;  %s2635_s30 = sphi %s2702_s30, %s3952_s30  }
   0x4   : > { %p35_p0 = scmp.ge.s32.totalorder %s33_s13, 3  ;;  %p2243_p1 = scmp.ge.s32.totalorder %s2643_s11, 1 }
   0x5   : > { %p267_p2 = scmp.lt.s32.totalorder %s2643_s11, 4  ;;  %p2729_p4 = scmp.eq.s32.totalorder %s2242_s12, 0 }
   0x6   : > { %s3955_s13 = smov (%p35_p0, %s33_s13), 0  ;;  %s280_s18 = sshll.u32 %s3906_s0, 4  ;;  %s281_s18 = int_to_ptr.vmem [resolvable:$true] %s280_s18 }
   0x7   : > { %p2723_p3 = pnand %p2243_p1, %p267_p2  ;;  %s2572_s19 = scalar_lea.vmem %s281_s18, 16 }
   0x8   : > { %p2573_p7 = scmp.ne.s32.totalorder %s281_s18, %s2572_s19  ;;  %p2580_p11 = scmp.lt.s32.totalorder %s281_s18, %s281_s18 }
   0x9   : > { %p2357_p5 = pneg %p2723_p3  ;;  %p2581_p12 = scmp.lt.s32.totalorder %s2572_s19, %s2572_s19 }
   0xb   : > { %p2358_p6 = pnand %p2729_p4, %p2357_p5  ;;  %p2582_p13 = por %p2581_p12, %p2580_p11 }
   0xd   : > { %p2574_p8 = pneg %p2358_p6 }
   0xf   : > { %p2575_p9 = pnand %p2574_p8, %p2573_p7 }
  0x11   : > { %p2576_p10 = pneg %p2575_p9 }
  0x13   : > { %p2583_p0 = pnand %p2582_p13, %p2576_p10 }
  0x15   : > { %2586 = shalt.err (!%p2583_p0)
}
  0x16   : > { %s2645_s20 = smov [#allocation6]   ;;  %337 = sbr.rel (%p2723_p3) target bundleno = 1254 (0x4e6), region = 56 }
  0x17   : > { %2360 = dma.vmem_to_smem (!%p2358_p6), %s281_s18, 16, %s2645_s20, [#allocation8]  }
  0x1d   : > { %2626 = dma.done.wait (%p2729_p4), [#allocation8], 16  }
  0x1e   : > { %2628 = vsyncadd (%p2729_p4), [#allocation8], 4294967280 }
  0x1f   : > { %343 = sfence }
  0x20   : > { %p384_p1 = scmp.lt.s32.totalorder %s2635_s30, 2  ;;  %v996_v0 = vld [vmem:[%s3907_s1] sm:$0xff]  ;;  %v2646_v1 = vmov 0   ;;  %v997_v2 = vld [vmem:[%s3907_s1 + $0x8] sm:$0xff]  ;;  %v998_v3 = vld [vmem:[%s3907_s1 + $0x10] sm:$0xff]  ;;  %vm537_vm0 = vcmask 261120  }
  0x21   : > { %2396 = vset.pattern.permute.xlu1 %v2646_v1  ;;  %2397 = vset.pattern.permute.xlu0 %v2646_v1  ;;  %v1000_v4 = vld [vmem:[%s3907_s1 + $0x20] sm:$0xff]  ;;  %v999_v6 = vld [vmem:[%s3907_s1 + $0x18] sm:$0xff]  ;;  %vm409_vm1 = vcmask 7168   ;;  %v2647_v16 = vmov -inf   ;;  %v2648_v50 = vmov 0.0   ;;  %v1005_v1 = vld [vmem:[%s3907_s1 + $0x48] sm:$0xff] }
  0x22   : > { %s2754_s25 = scalar_select %p384_p1, %s2635_s30, 2  ;;  %1034 = vperm.xlu1 %2396, %v996_v0   ;;  %1037 = vperm.xlu0 %2397, %v997_v2   ;;  %420 = vst.msk [vmem:[#allocation2 + $0x50] sm:$0xff] %vm409_vm1, %v2647_v16  ;;  %410 = vst.msk [vmem:[#allocation2] sm:$0xff] %vm409_vm1, %v2647_v16 }
  0x23   : > { %411 = vst.msk [vmem:[#allocation2 + $0x8] sm:$0xff] %vm409_vm1, %v2647_v16  ;;  %412 = vst.msk [vmem:[#allocation2 + $0x10] sm:$0xff] %vm409_vm1, %v2647_v16  ;;  %p1326_p2 = scmp.eq.s32.totalorder %s2635_s30, 2  ;;  %s2271_s17 = sshll.u32 %s2635_s30, 7 }
  0x24   : > { %s2310_s14 = sshll.u32 %s2754_s25, 6  ;;  %s2311_s15 = sshll.u32 %s2754_s25, 4  ;;  %413 = vst.msk [vmem:[#allocation2 + $0x18] sm:$0xff] %vm409_vm1, %v2647_v16  ;;  %414 = vst.msk [vmem:[#allocation2 + $0x20] sm:$0xff] %vm409_vm1, %v2647_v16 }
  0x25   : > { %s397_s18 = scalar_lea.vmem %s3913_s7, %s2311_s15  ;;  %s388_s21 = scalar_lea.vmem %s3912_s6, %s2310_s14  ;;  %415 = vst.msk [vmem:[#allocation2 + $0x28] sm:$0xff] %vm409_vm1, %v2647_v16  ;;  %416 = vst.msk [vmem:[#allocation2 + $0x30] sm:$0xff] %vm409_vm1, %v2647_v16 }
  0x26   : > { %v2398_v5 = vld [vmem:[%s397_s18] sm:$0xff]   ;;  %1040 = vperm.xlu1 %2396, %v998_v3   ;;  %1046 = vperm.xlu0 %2397, %v1000_v4   ;;  %v2399_v7 = vld [vmem:[%s397_s18 + $0x8] sm:$0xff]   ;;  %v2404_v12 = vld [vmem:[%s388_s21 + $0x10] sm:$0xff]   ;;  %417 = vst.msk [vmem:[#allocation2 + $0x38] sm:$0xff] %vm409_vm1, %v2647_v16  ;;  %s403_s27 = scalar_lea.vmem %s3914_s8, %s2754_s25  ;;  %s3206_s18 = scalar_lea.vmem [#allocation5], %s2271_s17 }
  0x27   : > { %2323 = vmatprep.subr.bf16.mxu0 %v2398_v5  ;;  %2343 = vmatprep.subr.bf16.mxu1 %v2398_v5  ;;  %v2400_v8 = vld [vmem:[%s388_s21] sm:$0xff]   ;;  %v2402_v10 = vld [vmem:[%s388_s21 + $0x8] sm:$0xff]   ;;  %v2406_v13 = vld [vmem:[%s388_s21 + $0x30] sm:$0xff]   ;;  %418 = vst.msk [vmem:[#allocation2 + $0x40] sm:$0xff] %vm409_vm1, %v2647_v16  ;;  %s3291_s30 = sld [smem:[#allocation6]] (%p1326_p2)  ;;  %s3312_s25 = sld [smem:[#allocation6 + $0x1]] (%p1326_p2) }
  0x28   : > { %2324 = vmatpush3.bf16.msra.mxu0 %v2398_v5  ;;  %2345 = vmatpush3.bf16.msra.mxu1 %v2398_v5  ;;  %v2401_v9 = vld [vmem:[%s388_s21 + $0x20] sm:$0xff]   ;;  %v2403_v11 = vld [vmem:[%s388_s21 + $0x28] sm:$0xff]   ;;  %v2405_v14 = vld [vmem:[%s388_s21 + $0x18] sm:$0xff]   ;;  %419 = vst.msk [vmem:[#allocation2 + $0x48] sm:$0xff] %vm409_vm1, %v2647_v16 }
  0x29   : > { %2325 = vmatprep.subr.bf16.mxu0 %v2399_v7  ;;  %2344 = vmatprep.subr.bf16.mxu1 %v2399_v7  ;;  %v2407_v15 = vld [vmem:[%s388_s21 + $0x38] sm:$0xff]   ;;  %421 = vst.msk [vmem:[#allocation2 + $0x58] sm:$0xff] %vm409_vm1, %v2647_v16  ;;  %422 = vst.msk [vmem:[#allocation2 + $0x60] sm:$0xff] %vm409_vm1, %v2647_v16  ;;  %v2252_v17 = vld [vmem:[%s403_s27] ss:$0 sm:$0xff] }
  0x2a   : > { %2327 = vmatprep.mubr.msk.bf16.mxu0 %vm537_vm0, %v2400_v8  ;;  %1043 = vperm.xlu1 %2396, %v999_v6   ;;  %423 = vst.msk [vmem:[#allocation2 + $0x68] sm:$0xff] %vm409_vm1, %v2647_v16  ;;  %424 = vst.msk [vmem:[#allocation2 + $0x70] sm:$0xff] %vm409_vm1, %v2647_v16  ;;  %v2891_v56 = vld [vmem:[#allocation2 + $0x50] sm:$0xff]  ;;  %v2903_v63 = vld [vmem:[#allocation2] sm:$0xff] }
  0x2b   : > { %2335 = vmatprep.mubr.msk.bf16.mxu1 %vm537_vm0, %v2401_v9  ;;  %425 = vst.msk [vmem:[#allocation2 + $0x78] sm:$0xff] %vm409_vm1, %v2647_v16  ;;  %442 = vst.msk [vmem:[#allocation4] sm:$0xff] %vm409_vm1, %v2648_v50  ;;  %v2893_v57 = vld [vmem:[#allocation2 + $0x10] sm:$0xff]  ;;  %v2901_v62 = vld [vmem:[#allocation2 + $0x18] sm:$0xff] }
  0x2c   : > { %2326 = vmatpush3.bf16.msra.mxu0 %v2399_v7  ;;  %2346 = vmatpush3.bf16.msra.mxu1 %v2399_v7  ;;  %426 = vst.msk [vmem:[#allocation3] sm:$0xff] %vm409_vm1, %v2648_v50  ;;  %427 = vst.msk [vmem:[#allocation3 + $0x8] sm:$0xff] %vm409_vm1, %v2648_v50 }
  0x2d   : > { %428 = vst.msk [vmem:[#allocation3 + $0x10] sm:$0xff] %vm409_vm1, %v2648_v50  ;;  %429 = vst.msk [vmem:[#allocation3 + $0x18] sm:$0xff] %vm409_vm1, %v2648_v50  ;;  %s1495_s16 = ssub.f32 (%p1326_p2), 1.0, %s3291_s30 }
  0x2e   : > { %430 = vst.msk [vmem:[#allocation3 + $0x20] sm:$0xff] %vm409_vm1, %v2648_v50  ;;  %431 = vst.msk [vmem:[#allocation3 + $0x28] sm:$0xff] %vm409_vm1, %v2648_v50  ;;  %v2922_v7 = vld [vmem:[#allocation2 + $0x40] sm:$0xff]  ;;  %s1496_s17 = sadd.f32 (%p1326_p2), 1.0, %s3291_s30 }
  0x2f   : > { %2328 = vmatmul.mubr.msk.bf16.vlgmr.msra.gmra.mrb[0].mxu0 %vm537_vm0, %v2402_v10  ;;  %2336 = vmatmul.mubr.msk.bf16.vlgmr.msra.gmra.mrb[0].mxu1 %vm537_vm0, %v2403_v11  ;;  %432 = vst.msk [vmem:[#allocation3 + $0x30] sm:$0xff] %vm409_vm1, %v2648_v50  ;;  %433 = vst.msk [vmem:[#allocation3 + $0x38] sm:$0xff] %vm409_vm1, %v2648_v50 }
  0x30   : > { %2331 = vmatprep.mubr.msk.bf16.mxu0 %vm537_vm0, %v2404_v12  ;;  %2339 = vmatprep.mubr.msk.bf16.mxu1 %vm537_vm0, %v2406_v13  ;;  %434 = vst.msk [vmem:[#allocation3 + $0x40] sm:$0xff] %vm409_vm1, %v2648_v50  ;;  %435 = vst.msk [vmem:[#allocation3 + $0x48] sm:$0xff] %vm409_vm1, %v2648_v50  ;;  %v2920_v6 = vld [vmem:[#allocation2 + $0x58] sm:$0xff] }
  0x31   : > { %436 = vst.msk [vmem:[#allocation3 + $0x50] sm:$0xff] %vm409_vm1, %v2648_v50  ;;  %437 = vst.msk [vmem:[#allocation3 + $0x58] sm:$0xff] %vm409_vm1, %v2648_v50 }
  0x32   : > { %438 = vst.msk [vmem:[#allocation3 + $0x60] sm:$0xff] %vm409_vm1, %v2648_v50  ;;  %439 = vst.msk [vmem:[#allocation3 + $0x68] sm:$0xff] %vm409_vm1, %v2648_v50 }
  0x33   : > { %440 = vst.msk [vmem:[#allocation3 + $0x70] sm:$0xff] %vm409_vm1, %v2648_v50  ;;  %441 = vst.msk [vmem:[#allocation3 + $0x78] sm:$0xff] %vm409_vm1, %v2648_v50 }
  0x34   : > { %443 = vst.msk [vmem:[#allocation4 + $0x8] sm:$0xff] %vm409_vm1, %v2648_v50  ;;  %444 = vst.msk [vmem:[#allocation4 + $0x10] sm:$0xff] %vm409_vm1, %v2648_v50 }
  0x35   : > { %445 = vst.msk [vmem:[#allocation4 + $0x18] sm:$0xff] %vm409_vm1, %v2648_v50  ;;  %446 = vst.msk [vmem:[#allocation4 + $0x20] sm:$0xff] %vm409_vm1, %v2648_v50 }
  0x36   : > { %447 = vst.msk [vmem:[#allocation4 + $0x28] sm:$0xff] %vm409_vm1, %v2648_v50  ;;  %448 = vst.msk [vmem:[#allocation4 + $0x30] sm:$0xff] %vm409_vm1, %v2648_v50 }
  0x37   : > { %2332 = vmatmul.mubr.msk.bf16.gmra.mrb[4].mxu0 %vm537_vm0, %v2405_v14  ;;  %2340 = vmatmul.mubr.msk.bf16.gmra.mrb[4].mxu1 %vm537_vm0, %v2407_v15  ;;  %449 = vst.msk [vmem:[#allocation4 + $0x38] sm:$0xff] %vm409_vm1, %v2648_v50  ;;  %450 = vst.msk [vmem:[#allocation4 + $0x40] sm:$0xff] %vm409_vm1, %v2648_v50  ;;  %v2940_v14 = vld [vmem:[#allocation2 + $0x48] sm:$0xff] }
  0x38   : > { %451 = vst.msk [vmem:[#allocation4 + $0x48] sm:$0xff] %vm409_vm1, %v2648_v50  ;;  %452 = vst.msk [vmem:[#allocation4 + $0x50] sm:$0xff] %vm409_vm1, %v2648_v50  ;;  %v2942_v15 = vld [vmem:[#allocation2 + $0x8] sm:$0xff] }
  0x39   : > { %453 = vst.msk [vmem:[#allocation4 + $0x58] sm:$0xff] %vm409_vm1, %v2648_v50  ;;  %454 = vst.msk [vmem:[#allocation4 + $0x60] sm:$0xff] %vm409_vm1, %v2648_v50 }
  0x3a   : > { %455 = vst.msk [vmem:[#allocation4 + $0x68] sm:$0xff] %vm409_vm1, %v2648_v50  ;;  %456 = vst.msk [vmem:[#allocation4 + $0x70] sm:$0xff] %vm409_vm1, %v2648_v50 }
  0x3b   : > { %457 = vst.msk [vmem:[#allocation4 + $0x78] sm:$0xff] %vm409_vm1, %v2648_v50 }
  0xa1   : > { %v2881_v51 = vpop.permute.xlu1 %1034  ;;  %v2885_v53 = vpop.permute.xlu0 %1037 }
  0xa5   : > { %v2883_v52 = vpop.permute.xlu1 %1040  ;;  %v2889_v55 = vpop.permute.xlu0 %1046 }
  0xa9   : > { %v2887_v54 = vpop.permute.xlu1 %1043 }
 0x102   : > { %v2329_v18 = vpop.f32.mrb[0].mxu0  ;;  %v2337_v19 = vpop.f32.mrb[0].mxu1 }
 0x103   : > { %v2801_v20 = vadd.f32 %v2329_v18, %v2252_v17  ;;  %v2803_v21 = vadd.f32 %v2337_v19, %v2252_v17  ;;  %v596_v22 = vpop.f32.mrb[1].mxu0  ;;  %v628_v23 = vpop.f32.mrb[1].mxu1 }
 0x104   : > { %v2805_v24 = vadd.f32 %v2252_v17, %v596_v22  ;;  %v2330_v25 = vpop.f32.mrb[2].mxu0  ;;  %v2807_v26 = vadd.f32 %v2252_v17, %v628_v23  ;;  %v2338_v27 = vpop.f32.mrb[2].mxu1 }
 0x105   : > { %v2809_v28 = vadd.f32 %v2330_v25, %v2252_v17  ;;  %679 = vmax.xlane.f32.xlu0 %v2803_v21  ;;  %v2812_v29 = vadd.f32 %v2338_v27, %v2252_v17  ;;  %663 = vmax.xlane.f32.xlu1 %v2801_v20  ;;  %v599_v30 = vpop.f32.mrb[3].mxu0  ;;  %v631_v31 = vpop.f32.mrb[3].mxu1  ;;  %v2960_v25 = vld [vmem:[#allocation2 + $0x38] sm:$0xff]  ;;  %v2962_v27 = vld [vmem:[#allocation2 + $0x30] sm:$0xff] }
 0x106   : > { %v2815_v32 = vadd.f32 %v2252_v17, %v599_v30  ;;  %v2817_v33 = vadd.f32 %v2252_v17, %v631_v31  ;;  %3924 = vst [vmem:[#allocation12_spill] sm:$0xff] %v2960_v25 }
 0x109   : > { %665 = vmax.xlane.f32.xlu1 %v2809_v28  ;;  %659 = vmax.xlane.f32.xlu0 %v2805_v24 }
 0x10a   : > { %v2333_v34 = vpop.f32.mrb[4].mxu0  ;;  %v2341_v35 = vpop.f32.mrb[4].mxu1 }
 0x10b   : > { %v2821_v36 = vadd.f32 %v2333_v34, %v2252_v17  ;;  %v612_v37 = vpop.f32.mrb[5].mxu0  ;;  %v2823_v38 = vadd.f32 %v2341_v35, %v2252_v17  ;;  %v644_v39 = vpop.f32.mrb[5].mxu1 }
 0x10c   : > { %v2825_v40 = vadd.f32 %v2252_v17, %v612_v37  ;;  %v2334_v41 = vpop.f32.mrb[6].mxu0  ;;  %v2827_v42 = vadd.f32 %v2252_v17, %v644_v39  ;;  %v2342_v43 = vpop.f32.mrb[6].mxu1 }
 0x10d   : > { %681 = vmax.xlane.f32.xlu1 %v2812_v29  ;;  %675 = vmax.xlane.f32.xlu0 %v2807_v26  ;;  %v2831_v44 = vadd.f32 %v2334_v41, %v2252_v17  ;;  %v615_v45 = vpop.f32.mrb[7].mxu0  ;;  %v2833_v46 = vadd.f32 %v2342_v43, %v2252_v17  ;;  %v647_v47 = vpop.f32.mrb[7].mxu1  ;;  %v2980_v41 = vld [vmem:[#allocation2 + $0x78] sm:$0xff]  ;;  %v2982_v43 = vld [vmem:[#allocation2 + $0x70] sm:$0xff] }
 0x10e   : > { %v2835_v48 = vadd.f32 %v2252_v17, %v615_v45  ;;  %v2837_v49 = vadd.f32 %v2252_v17, %v647_v47  ;;  %v3021_v45 = vld [vmem:[#allocation2 + $0x60] sm:$0xff] }
 0x111   : > { %677 = vmax.xlane.f32.xlu1 %v2817_v33  ;;  %661 = vmax.xlane.f32.xlu0 %v2815_v32 }
 0x115   : > { %673 = vmax.xlane.f32.xlu1 %v2831_v44  ;;  %671 = vmax.xlane.f32.xlu0 %v2821_v36 }
 0x119   : > { %689 = vmax.xlane.f32.xlu1 %v2833_v46  ;;  %687 = vmax.xlane.f32.xlu0 %v2823_v38 }
 0x11d   : > { %669 = vmax.xlane.f32.xlu1 %v2835_v48  ;;  %667 = vmax.xlane.f32.xlu0 %v2825_v40 }
 0x121   : > { %685 = vmax.xlane.f32.xlu1 %v2837_v49  ;;  %683 = vmax.xlane.f32.xlu0 %v2827_v42 }
 0x192   : > { %v680_v58 = vpop.xlane.xlu0 %679  ;;  %v664_v59 = vpop.xlane.xlu1 %663 }
 0x193   : > { %v2896_v60 = vmax.f32 %v2891_v56, %v680_v58  ;;  %v2899_v61 = vmax.f32 %v2893_v57, %v664_v59 }
 0x195   : > { %1187 = vst.msk [vmem:[#allocation2 + $0x50] sm:$0xff] %vm409_vm1, %v2896_v60  ;;  %1179 = vst.msk [vmem:[#allocation2 + $0x10] sm:$0xff] %vm409_vm1, %v2899_v61  ;;  %815 = vperm.xlu1 %2396, %v2899_v61  }
 0x196   : > { %v666_v2 = vpop.xlane.xlu1 %665  ;;  %v660_v3 = vpop.xlane.xlu0 %659 }
 0x197   : > { %v2915_v4 = vmax.f32 %v2901_v62, %v666_v2  ;;  %v2918_v5 = vmax.f32 %v2903_v63, %v660_v3  ;;  %v2999_v3 = vld [vmem:[#allocation2 + $0x28] sm:$0xff] }
 0x198   : > { %3926 = vst [vmem:[#allocation14_spill] sm:$0xff] %v2999_v3 }
 0x199   : > { %1180 = vst.msk [vmem:[#allocation2 + $0x18] sm:$0xff] %vm409_vm1, %v2915_v4  ;;  %1177 = vst.msk [vmem:[#allocation2] sm:$0xff] %vm409_vm1, %v2918_v5  ;;  %855 = vperm.xlu1 %2396, %v2896_v60   ;;  %805 = vperm.xlu0 %2397, %v2918_v5  }
 0x19a   : > { %v682_v10 = vpop.xlane.xlu1 %681  ;;  %v676_v11 = vpop.xlane.xlu0 %675 }
 0x19b   : > { %v2935_v12 = vmax.f32 %v2920_v6, %v682_v10  ;;  %v2938_v13 = vmax.f32 %v2922_v7, %v676_v11  ;;  %v3001_v10 = vld [vmem:[#allocation2 + $0x20] sm:$0xff] }
 0x19d   : > { %1188 = vst.msk [vmem:[#allocation2 + $0x58] sm:$0xff] %vm409_vm1, %v2935_v12  ;;  %1185 = vst.msk [vmem:[#allocation2 + $0x40] sm:$0xff] %vm409_vm1, %v2938_v13  ;;  %860 = vperm.xlu0 %2397, %v2935_v12   ;;  %845 = vperm.xlu1 %2396, %v2938_v13  }
 0x19e   : > { %v678_v18 = vpop.xlane.xlu1 %677  ;;  %v662_v19 = vpop.xlane.xlu0 %661 }
 0x19f   : > { %v2955_v22 = vmax.f32 %v2940_v14, %v678_v18  ;;  %v2958_v23 = vmax.f32 %v2942_v15, %v662_v19  ;;  %v1003_v18 = vld [vmem:[%s3907_s1 + $0x38] sm:$0xff] }
 0x1a1   : > { %1186 = vst.msk [vmem:[#allocation2 + $0x48] sm:$0xff] %vm409_vm1, %v2955_v22  ;;  %1178 = vst.msk [vmem:[#allocation2 + $0x8] sm:$0xff] %vm409_vm1, %v2958_v23  ;;  %850 = vperm.xlu0 %2397, %v2955_v22   ;;  %820 = vperm.xlu1 %2396, %v2915_v4  }
 0x1a2   : > { %v674_v34 = vpop.xlane.xlu1 %673  ;;  %v672_v35 = vpop.xlane.xlu0 %671 }
 0x1a3   : > { %v2975_v37 = vmax.f32 %v2960_v25, %v674_v34  ;;  %v2978_v39 = vmax.f32 %v2962_v27, %v672_v35 }
 0x1a5   : > { %3925 = vst [vmem:[#allocation13_spill] sm:$0xff] %v2975_v37  ;;  %1184 = vst.msk [vmem:[#allocation2 + $0x38] sm:$0xff] %vm409_vm1, %v2975_v37  ;;  %810 = vperm.xlu1 %2396, %v2958_v23  }
 0x1a6   : > { %1183 = vst.msk [vmem:[#allocation2 + $0x30] sm:$0xff] %vm409_vm1, %v2978_v39  ;;  %v690_v50 = vpop.xlane.xlu1 %689  ;;  %v688_v58 = vpop.xlane.xlu0 %687 }
 0x1a7   : > { %v2994_v59 = vmax.f32 %v2980_v41, %v690_v50  ;;  %v2997_v2 = vmax.f32 %v2982_v43, %v688_v58  ;;  %v3019_v58 = vld [vmem:[#allocation2 + $0x68] sm:$0xff] }
 0x1a8   : > { %3928 = vst [vmem:[#allocation16_spill] sm:$0xff] %v3019_v58 }
 0x1a9   : > { %1192 = vst.msk [vmem:[#allocation2 + $0x78] sm:$0xff] %vm409_vm1, %v2994_v59  ;;  %1191 = vst.msk [vmem:[#allocation2 + $0x70] sm:$0xff] %vm409_vm1, %v2997_v2  ;;  %880 = vperm.xlu0 %2397, %v2994_v59   ;;  %835 = vperm.xlu1 %2396, %v2978_v39  }
 0x1aa   : > { %v670_v19 = vpop.xlane.xlu1 %669  ;;  %v668_v34 = vpop.xlane.xlu0 %667 }
 0x1ab   : > { %v3014_v35 = vmax.f32 %v2999_v3, %v670_v19  ;;  %v3017_v50 = vmax.f32 %v3001_v10, %v668_v34 }
 0x1ad   : > { %3927 = vst [vmem:[#allocation15_spill] sm:$0xff] %v3014_v35  ;;  %1182 = vst.msk [vmem:[#allocation2 + $0x28] sm:$0xff] %vm409_vm1, %v3014_v35  ;;  %875 = vperm.xlu1 %2396, %v2997_v2  }
 0x1ae   : > { %1181 = vst.msk [vmem:[#allocation2 + $0x20] sm:$0xff] %vm409_vm1, %v3017_v50  ;;  %v686_v19 = vpop.xlane.xlu1 %685  ;;  %v684_v34 = vpop.xlane.xlu0 %683 }
 0x1af   : > { %v3033_v17 = vmax.f32 %v3019_v58, %v686_v19  ;;  %v3036_v0 = vmax.f32 %v3021_v45, %v684_v34  ;;  %v1012_v19 = vlaneseq  ;;  %v1001_v34 = vld [vmem:[%s3907_s1 + $0x28] sm:$0xff] }
 0x1b1   : > { %3929 = vst [vmem:[#allocation17_spill] sm:$0xff] %v3033_v17  ;;  %1190 = vst.msk [vmem:[#allocation2 + $0x68] sm:$0xff] %vm409_vm1, %v3033_v17  ;;  %825 = vperm.xlu1 %2396, %v3017_v50   ;;  %v3051_v31 = vand.u32 127, %v1012_v19  ;;  %v1007_v19 = vld [vmem:[%s3907_s1 + $0x58] sm:$0xff] }
 0x1b2   : > { %1189 = vst.msk [vmem:[#allocation2 + $0x60] sm:$0xff] %vm409_vm1, %v3036_v0 }
 0x1b3   : > { %vm1081_vm2 = vcmp.eq.s32.totalorder %v3051_v31, %v2881_v51  ;;  %vm1083_vm3 = vcmp.eq.s32.totalorder %v3051_v31, %v2883_v52  ;;  %vm1085_vm4 = vcmp.eq.s32.totalorder %v3051_v31, %v2889_v55  ;;  %v1009_v51 = vld [vmem:[%s3907_s1 + $0x68] sm:$0xff]  ;;  %v1011_v52 = vld [vmem:[%s3907_s1 + $0x78] sm:$0xff]  ;;  %v1004_v55 = vld [vmem:[%s3907_s1 + $0x40] sm:$0xff]  ;;  %vm1082_vm5 = vcmp.eq.s32.totalorder %v3051_v31, %v2885_v53 }
 0x1b4   : > { %v1097_v11 = vsel %vm1081_vm2, %v2805_v24, 0.0  ;;  %vm1084_vm6 = vcmp.eq.s32.totalorder %v3051_v31, %v2887_v54 }
 0x1b5   : > { %865 = vperm.xlu1 %2396, %v3036_v0  }
 0x1b9   : > { %840 = vperm.xlu1 %2396, %v2975_v37  }
 0x1bd   : > { %830 = vperm.xlu1 %2396, %v3014_v35  }
 0x1c1   : > { %1049 = vperm.xlu1 %2396, %v1001_v34   ;;  %v1099_v34 = vsel %vm1083_vm3, %v2801_v20, 0.0 }
 0x1c5   : > { %1055 = vperm.xlu1 %2396, %v1003_v18   ;;  %v1101_v18 = vsel %vm1085_vm4, %v2825_v40, 0.0 }
 0x1c8   : > { %1113 = vadd.xlane.f32.xlu0 %v1097_v11  ;;  %v1006_v11 = vld [vmem:[%s3907_s1 + $0x50] sm:$0xff] }
 0x1c9   : > { %1061 = vperm.xlu1 %2396, %v1005_v1   ;;  %v1002_v1 = vld [vmem:[%s3907_s1 + $0x30] sm:$0xff] }
 0x1cc   : > { %1117 = vadd.xlane.f32.xlu0 %v1099_v34  ;;  %v1010_v34 = vld [vmem:[%s3907_s1 + $0x70] sm:$0xff] }
 0x1cd   : > { %1067 = vperm.xlu1 %2396, %v1007_v19   ;;  %v1008_v19 = vld [vmem:[%s3907_s1 + $0x60] sm:$0xff] }
 0x1d0   : > { %1121 = vadd.xlane.f32.xlu0 %v1101_v18  ;;  %v1100_v18 = vsel %vm1084_vm6, %v2809_v28, 0.0 }
 0x1d1   : > { %1073 = vperm.xlu1 %2396, %v1009_v51   ;;  %v1098_v51 = vsel %vm1082_vm5, %v2815_v32, 0.0 }
 0x1d5   : > { %1079 = vperm.xlu1 %2396, %v1011_v52  }
 0x1e6   : > { %1052 = vperm.xlu0 %2397, %v1002_v1  }
 0x1ea   : > { %1058 = vperm.xlu0 %2397, %v1004_v55  }
 0x1ee   : > { %1064 = vperm.xlu0 %2397, %v1006_v11  }
 0x1f2   : > { %1070 = vperm.xlu0 %2397, %v1008_v19  }
 0x1f6   : > { %1076 = vperm.xlu0 %2397, %v1010_v34  }
 0x1f9   : > { %1115 = vadd.xlane.f32.xlu1 %v1098_v51 }
 0x1fa   : > { %870 = vperm.xlu0 %2397, %v3033_v17  }
 0x1fd   : > { %1119 = vadd.xlane.f32.xlu1 %v1100_v18 }
 0x214   : > { %v816_v52 = vpop.permute.xlu1 %815 }
 0x218   : > { %v3099_v1 = vpop.permute.xlu1 %855  ;;  %v806_v51 = vpop.permute.xlu0 %805 }
 0x219   : > { %v883_v30 = vsub.f32 %v2805_v24, %v806_v51 }
 0x21b   : > { %v899_v8 = vmul.f32 1.442695, %v883_v30 }
 0x21c   : > { %v3101_v55 = vpop.permute.xlu1 %845  ;;  %v861_v18 = vpop.permute.xlu0 %860 }
 0x21d   : > { %2408 = vpow2.f32 %v899_v8  ;;  %v894_v3 = vsub.f32 %v2812_v29, %v861_v18 }
 0x21f   : > { %v921_v24 = vmul.f32 1.442695, %v894_v3 }
 0x220   : > { %v821_v11 = vpop.permute.xlu1 %820  ;;  %v851_v58 = vpop.permute.xlu0 %850 }
 0x221   : > { %v886_v9 = vsub.f32 %v2809_v28, %v821_v11  ;;  %v892_v51 = vsub.f32 %v2817_v33, %v851_v58 }
 0x223   : > { %v905_v37 = vmul.f32 1.442695, %v886_v9  ;;  %v917_v8 = vmul.f32 1.442695, %v892_v51 }
 0x224   : > { %v3103_v19 = vpop.permute.xlu1 %810 }
 0x225   : > { %2410 = vpow2.f32 %v905_v37 }
 0x226   : > { %2412 = vpow2.f32 %v921_v24 }
 0x227   : > { %v2409_v18 = vpop.eup %2408  ;;  %2414 = vpow2.f32 %v917_v8  ;;  %v885_v8 = vsub.f32 %v2801_v20, %v816_v52  ;;  %v891_v20 = vsub.f32 %v2807_v26, %v3101_v55 }
 0x228   : > { %v836_v53 = vpop.permute.xlu1 %835  ;;  %v881_v11 = vpop.permute.xlu0 %880 }
 0x229   : > { %v889_v9 = vsub.f32 %v2821_v36, %v836_v53  ;;  %v1019_v53 = vld [vmem:[#allocation4 + $0x10] sm:$0xff]  ;;  %v915_v52 = vmul.f32 1.442695, %v891_v20 }
 0x22c   : > { %v3105_v34 = vpop.permute.xlu1 %875 }
 0x22f   : > { %v2411_v37 = vpop.eup %2410 }
 0x230   : > { %v3107_v47 = vpop.permute.xlu1 %825  ;;  %v2413_v58 = vpop.eup %2412 }
 0x231   : > { %v2415_v24 = vpop.eup %2414 }
 0x234   : > { %v3109_v54 = vpop.permute.xlu1 %865 }
 0x238   : > { %v3112_v16 = vpop.permute.xlu1 %840 }
 0x23c   : > { %v3115_v35 = vpop.permute.xlu1 %830 }
 0x23d   : > { %v888_v20 = vsub.f32 %v2835_v48, %v3115_v35 }
 0x240   : > { %v1050_v25 = vpop.permute.xlu1 %1049 }
 0x241   : > { %vm1086_vm7 = vcmp.eq.s32.totalorder %v3051_v31, %v1050_v25  ;;  %v911_v25 = vmul.f32 1.442695, %v889_v9 }
 0x242   : > { %v1102_v17 = vsel %vm1086_vm7, %v2835_v48, 0.0 }
 0x243   : > { %1123 = vadd.xlane.f32.xlu1 %v1102_v17  ;;  %v898_v17 = vsub.f32 %v2833_v46, %v881_v11  ;;  %2416 = vpow2.f32 %v911_v25  ;;  %v903_v25 = vmul.f32 1.442695, %v885_v8  ;;  %v897_v8 = vsub.f32 %v2823_v38, %v3105_v34 }
 0x244   : > { %v1056_v30 = vpop.permute.xlu1 %1055 }
 0x245   : > { %vm1088_vm8 = vcmp.eq.s32.totalorder %v3051_v31, %v1056_v30  ;;  %v929_v3 = vmul.f32 1.442695, %v898_v17  ;;  %v1017_v30 = vld [vmem:[#allocation4] sm:$0xff]  ;;  %v893_v17 = vsub.f32 %v2803_v21, %v3099_v1  ;;  %v927_v55 = vmul.f32 1.442695, %v897_v8 }
 0x246   : > { %v1104_v28 = vsel %vm1088_vm8, %v2831_v44, 0.0 }
 0x247   : > { %1127 = vadd.xlane.f32.xlu1 %v1104_v28  ;;  %2418 = vpow2.f32 %v929_v3 }
 0x248   : > { %2420 = vpow2.f32 %v903_v25  ;;  %v895_v25 = vsub.f32 %v2827_v42, %v3109_v54 }
 0x24a   : > { %v923_v34 = vmul.f32 1.442695, %v895_v25 }
 0x24b   : > { %931 = vadd.xlane.f32.xlu1 %v2409_v18 }
 0x24d   : > { %v2417_v18 = vpop.eup %2416 }
 0x24f   : > { %937 = vadd.xlane.f32.xlu1 %v2411_v37  ;;  %v1021_v37 = vld [vmem:[#allocation4 + $0x20] sm:$0xff] }
 0x253   : > { %953 = vadd.xlane.f32.xlu1 %v2413_v58  ;;  %v2419_v58 = vpop.eup %2418 }
 0x255   : > { %v1114_v28 = vpop.xlane.xlu0 %1113 }
 0x256   : > { %v1145_v51 = vadd.f32 %v1114_v28, %v1017_v30  ;;  %v919_v28 = vmul.f32 1.442695, %v893_v17 }
 0x257   : > { %949 = vadd.xlane.f32.xlu1 %v2415_v24  ;;  %v884_v24 = vsub.f32 %v2815_v32, %v3103_v19 }
 0x258   : > { %1161 = vst.msk [vmem:[#allocation4] sm:$0xff] %vm409_vm1, %v1145_v51  ;;  %2422 = vpow2.f32 %v919_v28 }
 0x259   : > { %v1118_v9 = vpop.xlane.xlu0 %1117  ;;  %2424 = vpow2.f32 %v915_v52 }
 0x25a   : > { %v1147_v11 = vadd.f32 %v1118_v9, %v1019_v53  ;;  %v901_v53 = vmul.f32 1.442695, %v884_v24 }
 0x25b   : > { %943 = vadd.xlane.f32.xlu1 %v2417_v18  ;;  %v2421_v18 = vpop.eup %2420 }
 0x25c   : > { %1163 = vst.msk [vmem:[#allocation4 + $0x10] sm:$0xff] %vm409_vm1, %v1147_v11  ;;  %2426 = vpow2.f32 %v901_v53  ;;  %v887_v11 = vsub.f32 %v2825_v40, %v3107_v47  ;;  %v909_v53 = vmul.f32 1.442695, %v888_v20 }
 0x25d   : > { %v1122_v3 = vpop.xlane.xlu0 %1121  ;;  %2428 = vpow2.f32 %v927_v55 }
 0x25e   : > { %v1149_v30 = vadd.f32 %v1122_v3, %v1021_v37  ;;  %v1062_v37 = vpop.permute.xlu1 %1061 }
 0x25f   : > { %961 = vadd.xlane.f32.xlu1 %v2419_v58  ;;  %v890_v58 = vsub.f32 %v2831_v44, %v3112_v16  ;;  %vm1090_vm10 = vcmp.eq.s32.totalorder %v3051_v31, %v1062_v37 }
 0x260   : > { %1165 = vst.msk [vmem:[#allocation4 + $0x20] sm:$0xff] %vm409_vm1, %v1149_v30 }
 0x261   : > { %v913_v47 = vmul.f32 1.442695, %v890_v58 }
 0x262   : > { %v2423_v19 = vpop.eup %2422  ;;  %v1068_v28 = vpop.permute.xlu1 %1067 }
 0x263   : > { %v2425_v3 = vpop.eup %2424  ;;  %vm1092_vm12 = vcmp.eq.s32.totalorder %v3051_v31, %v1068_v28 }
 0x264   : > { %v1108_v37 = vsel %vm1092_vm12, %v2812_v29, 0.0 }
 0x265   : > { %v1053_v51 = vpop.permute.xlu0 %1052 }
 0x266   : > { %vm1087_vm9 = vcmp.eq.s32.totalorder %v3051_v31, %v1053_v51  ;;  %v2427_v40 = vpop.eup %2426  ;;  %v1074_v51 = vpop.permute.xlu1 %1073 }
 0x267   : > { %v1103_v1 = vsel %vm1087_vm9, %v2821_v36, 0.0  ;;  %v907_v36 = vmul.f32 1.442695, %v887_v11  ;;  %v2429_v24 = vpop.eup %2428  ;;  %vm1094_vm14 = vcmp.eq.s32.totalorder %v3051_v31, %v1074_v51 }
 0x268   : > { %1125 = vadd.xlane.f32.xlu0 %v1103_v1 }
 0x269   : > { %v1059_v9 = vpop.permute.xlu0 %1058  ;;  %2430 = vpow2.f32 %v907_v36 }
 0x26a   : > { %2432 = vpow2.f32 %v923_v34  ;;  %v1080_v16 = vpop.permute.xlu1 %1079  ;;  %vm1089_vm11 = vcmp.eq.s32.totalorder %v3051_v31, %v1059_v9  ;;  %v1106_v34 = vsel %vm1090_vm10, %v2817_v33, 0.0  ;;  %v1110_v33 = vsel %vm1094_vm14, %v2837_v49, 0.0 }
 0x26b   : > { %2434 = vpow2.f32 %v913_v47  ;;  %v1105_v58 = vsel %vm1089_vm11, %v2807_v26, 0.0  ;;  %vm1096_vm0 = vcmp.eq.s32.totalorder %v3051_v31, %v1080_v16 }
 0x26c   : > { %935 = vadd.xlane.f32.xlu0 %v2421_v18  ;;  %v1018_v18 = vld [vmem:[#allocation4 + $0x8] sm:$0xff]  ;;  %v1112_v29 = vsel %vm1096_vm0, %v2833_v46, 0.0 }
 0x26d   : > { %v1065_v32 = vpop.permute.xlu0 %1064  ;;  %v1022_v46 = vld [vmem:[#allocation4 + $0x28] sm:$0xff] }
 0x26e   : > { %vm1091_vm13 = vcmp.eq.s32.totalorder %v3051_v31, %v1065_v32 }
 0x26f   : > { %v1107_v9 = vsel %vm1091_vm13, %v2803_v21, 0.0  ;;  %v3930_v21 = vsub.f32 %v2903_v63, %v2918_v5  ;;  %v1024_v63 = vld [vmem:[#allocation4 + $0x38] sm:$0xff] }
 0x270   : > { %951 = vadd.xlane.f32.xlu0 %v2423_v19  ;;  %v1020_v19 = vld [vmem:[#allocation4 + $0x18] sm:$0xff] }
 0x271   : > { %v1071_v17 = vpop.permute.xlu0 %1070 }
 0x272   : > { %vm1093_vm15 = vcmp.eq.s32.totalorder %v3051_v31, %v1071_v17  ;;  %v755_v17 = vmul.f32 1.442695, %v3930_v21  ;;  %v3937_v21 = vsub.f32 %v2891_v56, %v2896_v60  ;;  %v1196_v60 = vld [vmem:[#allocation4] sm:$0xff] }
 0x273   : > { %v2431_v44 = vpop.eup %2430  ;;  %v1109_v26 = vsel %vm1093_vm15, %v2827_v42, 0.0  ;;  %v3932_v42 = vsub.f32 %v2920_v6, %v2935_v12  ;;  %v3934_v6 = vsub.f32 %v2962_v27, %v2978_v39 }
 0x274   : > { %947 = vadd.xlane.f32.xlu0 %v2425_v3  ;;  %v2433_v8 = vpop.eup %2432 }
 0x275   : > { %v1077_v30 = vpop.permute.xlu0 %1076  ;;  %v2435_v11 = vpop.eup %2434  ;;  %v767_v12 = vmul.f32 1.442695, %v3934_v6 }
 0x276   : > { %vm1095_vm2 = vcmp.eq.s32.totalorder %v3051_v31, %v1077_v30  ;;  %v777_v30 = vmul.f32 1.442695, %v3932_v42  ;;  %v3938_v42 = vsub.f32 %v2922_v7, %v2938_v13  ;;  %v1023_v7 = vld [vmem:[#allocation4 + $0x30] sm:$0xff] }
 0x277   : > { %v1111_v32 = vsel %vm1095_vm2, %v2823_v38, 0.0  ;;  %v3933_v38 = vsub.f32 %v2940_v14, %v2955_v22  ;;  %v3935_v22 = vsub.f32 %v2980_v41, %v2994_v59 }
 0x278   : > { %933 = vadd.xlane.f32.xlu0 %v2427_v40 }
 0x279   : > { %v871_v52 = vpop.permute.xlu0 %870  ;;  %v773_v20 = vmul.f32 1.442695, %v3933_v38 }
 0x27a   : > { %v896_v54 = vsub.f32 %v2837_v49, %v871_v52  ;;  %v3931_v49 = vsub.f32 %v2901_v62, %v2915_v4  ;;  %v723_v4 = vld [vmem:[#allocation3] sm:$0xff] }
 0x27c   : > { %v925_v1 = vmul.f32 1.442695, %v896_v54  ;;  %959 = vadd.xlane.f32.xlu0 %v2429_v24  ;;  %v761_v28 = vmul.f32 1.442695, %v3931_v49 }
 0x27e   : > { %2436 = vpow2.f32 %v925_v1  ;;  %v726_v1 = vld [vmem:[#allocation3 + $0x18] sm:$0xff] }
 0x27f   : > { %2438 = vpow2.f32 %v909_v53  ;;  %v785_v53 = vmul.f32 1.442695, %v3935_v22 }
 0x280   : > { %939 = vadd.xlane.f32.xlu0 %v2431_v44  ;;  %2440 = vpow2.f32 %v755_v17  ;;  %v775_v17 = vmul.f32 1.442695, %v3937_v21 }
 0x281   : > { %2442 = vpow2.f32 %v761_v28 }
 0x282   : > { %2444 = vpow2.f32 %v777_v30  ;;  %v771_v30 = vmul.f32 1.442695, %v3938_v42  ;;  %v3949_v42 = vld [vmem:[#allocation15_spill] sm:$0xff] }
 0x283   : > { %2446 = vpow2.f32 %v773_v20 }
 0x284   : > { %955 = vadd.xlane.f32.xlu0 %v2433_v8  ;;  %2448 = vpow2.f32 %v767_v12 }
 0x285   : > { %2450 = vpow2.f32 %v785_v53  ;;  %v733_v53 = vld [vmem:[#allocation3 + $0x50] sm:$0xff] }
 0x286   : > { %v1116_v55 = vpop.xlane.xlu1 %1115 }
 0x287   : > { %v1146_v48 = vadd.f32 %v1116_v55, %v1018_v18  ;;  %v734_v18 = vld [vmem:[#allocation3 + $0x58] sm:$0xff] }
 0x288   : > { %v2437_v35 = vpop.eup %2436  ;;  %945 = vadd.xlane.f32.xlu0 %v2435_v11 }
 0x289   : > { %1162 = vst.msk [vmem:[#allocation4 + $0x8] sm:$0xff] %vm409_vm1, %v1146_v48  ;;  %957 = vadd.xlane.f32.xlu1 %v2437_v35  ;;  %v2439_v25 = vpop.eup %2438  ;;  %v732_v48 = vld [vmem:[#allocation3 + $0x48] sm:$0xff] }
 0x28a   : > { %v1120_v36 = vpop.xlane.xlu1 %1119  ;;  %v2441_v5 = vpop.eup %2440 }
 0x28b   : > { %v1148_v3 = vadd.f32 %v1120_v36, %v1020_v19  ;;  %v787_v54 = vmul.f32 %v2441_v5, %v723_v4  ;;  %v2443_v24 = vpop.eup %2442  ;;  %v1215_v5 = vld [vmem:[#allocation2 + $0x18] sm:$0xff] }
 0x28c   : > { %941 = vadd.xlane.f32.xlu0 %v2439_v25  ;;  %v790_v44 = vmul.f32 %v2443_v24, %v726_v1  ;;  %v2445_v16 = vpop.eup %2444  ;;  %v729_v25 = vld [vmem:[#allocation3 + $0x30] sm:$0xff] }
 0x28d   : > { %1164 = vst.msk [vmem:[#allocation4 + $0x18] sm:$0xff] %vm409_vm1, %v1148_v3  ;;  %1131 = vadd.xlane.f32.xlu1 %v1106_v34  ;;  %v798_v39 = vmul.f32 %v2445_v16, %v734_v18  ;;  %v2447_v55 = vpop.eup %2446  ;;  %v3941_v16 = vsub.f32 %v3001_v10, %v3017_v50 }
 0x28e   : > { %v796_v41 = vmul.f32 %v2447_v55, %v732_v48  ;;  %v2449_v59 = vpop.eup %2448  ;;  %v1218_v48 = vld [vmem:[#allocation2 + $0x30] sm:$0xff] }
 0x290   : > { %1129 = vadd.xlane.f32.xlu0 %v1105_v58  ;;  %v3936_v58 = vsub.f32 %v2893_v57, %v2899_v61 }
 0x291   : > { %1135 = vadd.xlane.f32.xlu1 %v1108_v37 }
 0x292   : > { %v759_v37 = vmul.f32 1.442695, %v3936_v58  ;;  %v724_v58 = vld [vmem:[#allocation3 + $0x8] sm:$0xff] }
 0x294   : > { %1133 = vadd.xlane.f32.xlu0 %v1107_v9  ;;  %v793_v9 = vmul.f32 %v2449_v59, %v729_v25  ;;  %v1199_v6 = vld [vmem:[#allocation4 + $0x18] sm:$0xff]  ;;  %v3944_v59 = vld [vmem:[#allocation16_spill] sm:$0xff] }
 0x295   : > { %1139 = vadd.xlane.f32.xlu1 %v1110_v33  ;;  %v2451_v33 = vpop.eup %2450 }
 0x298   : > { %1137 = vadd.xlane.f32.xlu0 %v1109_v26 }
 0x299   : > { %1143 = vadd.xlane.f32.xlu1 %v1112_v29  ;;  %v738_v29 = vld [vmem:[#allocation3 + $0x78] sm:$0xff] }
 0x29a   : > { %v802_v49 = vmul.f32 %v2451_v33, %v738_v29  ;;  %v3945_v33 = vld [vmem:[#allocation12_spill] sm:$0xff] }
 0x29c   : > { %1141 = vadd.xlane.f32.xlu0 %v1111_v32 }
 0x2d0   : > { %v1124_v40 = vpop.xlane.xlu1 %1123 }
 0x2d1   : > { %v1150_v47 = vadd.f32 %v1124_v40, %v1022_v46  ;;  %v1212_v40 = vld [vmem:[#allocation2] sm:$0xff] }
 0x2d3   : > { %1166 = vst.msk [vmem:[#allocation4 + $0x28] sm:$0xff] %vm409_vm1, %v1150_v47 }
 0x2d4   : > { %v1128_v62 = vpop.xlane.xlu1 %1127 }
 0x2d5   : > { %v1152_v52 = vadd.f32 %v1128_v62, %v1024_v63  ;;  %v3939_v62 = vsub.f32 %v2942_v15, %v2958_v23  ;;  %v3940_v15 = vsub.f32 %v2982_v43, %v2997_v2 }
 0x2d7   : > { %1168 = vst.msk [vmem:[#allocation4 + $0x38] sm:$0xff] %vm409_vm1, %v1152_v52  ;;  %v757_v4 = vmul.f32 1.442695, %v3939_v62  ;;  %v783_v23 = vmul.f32 1.442695, %v3940_v15  ;;  %v735_v62 = vld [vmem:[#allocation3 + $0x60] sm:$0xff] }
 0x2d8   : > { %v932_v51 = vpop.xlane.xlu1 %931 }
 0x2d9   : > { %v963_v14 = vadd.f32 %v932_v51, %v787_v54  ;;  %v725_v54 = vld [vmem:[#allocation3 + $0x10] sm:$0xff] }
 0x2db   : > { %980 = vst.msk [vmem:[#allocation3] sm:$0xff] %vm409_vm1, %v963_v14 }
 0x2dc   : > { %v938_v8 = vpop.xlane.xlu1 %937 }
 0x2dd   : > { %v966_v27 = vadd.f32 %v938_v8, %v790_v44  ;;  %v763_v8 = vmul.f32 1.442695, %v3941_v16 }
 0x2df   : > { %983 = vst.msk [vmem:[#allocation3 + $0x18] sm:$0xff] %vm409_vm1, %v966_v27 }
 0x2e0   : > { %v954_v11 = vpop.xlane.xlu1 %953 }
 0x2e1   : > { %v974_v35 = vadd.f32 %v954_v11, %v798_v39  ;;  %v731_v39 = vld [vmem:[#allocation3 + $0x40] sm:$0xff] }
 0x2e2   : > { %v1228_v19 = vld [vmem:[#allocation3] sm:$0xff] }
 0x2e3   : > { %2452 = vlog2.f32 %v1228_v19  ;;  %991 = vst.msk [vmem:[#allocation3 + $0x58] sm:$0xff] %vm409_vm1, %v974_v35  ;;  %v3942_v35 = vsub.f32 %v3021_v45, %v3036_v0 }
 0x2e4   : > { %v950_v36 = vpop.xlane.xlu1 %949 }
 0x2e5   : > { %v972_v3 = vadd.f32 %v950_v36, %v796_v41  ;;  %v779_v19 = vmul.f32 1.442695, %v3942_v35  ;;  %v3943_v41 = vld [vmem:[#allocation17_spill] sm:$0xff] }
 0x2e6   : > { %v1231_v34 = vld [vmem:[#allocation3 + $0x18] sm:$0xff]  ;;  %v752_v10 = vsub.f32 %v3944_v59, %v3943_v41  ;;  %v1026_v59 = vld [vmem:[#allocation4 + $0x48] sm:$0xff] }
 0x2e7   : > { %2454 = vlog2.f32 %v1231_v34  ;;  %989 = vst.msk [vmem:[#allocation3 + $0x48] sm:$0xff] %vm409_vm1, %v972_v3 }
 0x2e8   : > { %v944_v26 = vpop.xlane.xlu1 %943  ;;  %2456 = vpow2.f32 %v759_v37  ;;  %v781_v45 = vmul.f32 1.442695, %v752_v10 }
 0x2e9   : > { %v969_v32 = vadd.f32 %v944_v26, %v793_v9  ;;  %2458 = vpow2.f32 %v775_v17  ;;  %v3946_v26 = vld [vmem:[#allocation13_spill] sm:$0xff] }
 0x2ea   : > { %2460 = vpow2.f32 %v771_v30  ;;  %v3947_v29 = vsub.f32 %v3945_v33, %v3946_v26  ;;  %v1239_v16 = vld [vmem:[#allocation3 + $0x58] sm:$0xff]  ;;  %v1213_v26 = vld [vmem:[#allocation2 + $0x8] sm:$0xff] }
 0x2eb   : > { %986 = vst.msk [vmem:[#allocation3 + $0x30] sm:$0xff] %vm409_vm1, %v969_v32 }
 0x2ec   : > { %v962_v28 = vpop.xlane.xlu1 %961  ;;  %v769_v32 = vmul.f32 1.442695, %v3947_v29 }
 0x2ed   : > { %v2453_v57 = vpop.eup %2452  ;;  %v978_v61 = vadd.f32 %v962_v28, %v802_v49  ;;  %v737_v28 = vld [vmem:[#allocation3 + $0x70] sm:$0xff] }
 0x2ee   : > { %v1245_v46 = vmul.f32 0.6931472, %v2453_v57 }
 0x2ef   : > { %995 = vst.msk [vmem:[#allocation3 + $0x78] sm:$0xff] %vm409_vm1, %v978_v61  ;;  %v3948_v61 = vld [vmem:[#allocation14_spill] sm:$0xff] }
 0x2f0   : > { %v1276_v47 = vadd.f32 %v1245_v46, %v1212_v40  ;;  %v3950_v30 = vsub.f32 %v3948_v61, %v3949_v42 }
 0x2f1   : > { %v2455_v56 = vpop.eup %2454 }
 0x2f2   : > { %v1292_v38 = vsub.f32 %v1196_v60, %v1276_v47  ;;  %v1251_v20 = vmul.f32 0.6931472, %v2455_v56  ;;  %v1234_v63 = vld [vmem:[#allocation3 + $0x30] sm:$0xff]  ;;  %v2457_v52 = vpop.eup %2456  ;;  %v765_v46 = vmul.f32 1.442695, %v3950_v30  ;;  %v727_v60 = vld [vmem:[#allocation3 + $0x20] sm:$0xff] }
 0x2f3   : > { %2462 = vlog2.f32 %v1234_v63  ;;  %v789_v1 = vmul.f32 %v2457_v52, %v725_v54  ;;  %v2459_v14 = vpop.eup %2458 }
 0x2f4   : > { %1310 = vst.msk [vmem:[%s3206_s18] sm:$0xff] %vm409_vm1, %v1292_v38  ;;  %v1279_v13 = vadd.f32 %v1251_v20, %v1215_v5  ;;  %2464 = vpow2.f32 %v757_v4  ;;  %v2461_v18 = vpop.eup %2460  ;;  %v797_v27 = vmul.f32 %v2459_v14, %v733_v53  ;;  %v1198_v14 = vld [vmem:[#allocation4 + $0x10] sm:$0xff] }
 0x2f5   : > { %v1126_v12 = vpop.xlane.xlu0 %1125  ;;  %2466 = vpow2.f32 %v783_v23  ;;  %v795_v36 = vmul.f32 %v2461_v18, %v731_v39  ;;  %v730_v23 = vld [vmem:[#allocation3 + $0x38] sm:$0xff]  ;;  %v728_v39 = vld [vmem:[#allocation3 + $0x28] sm:$0xff] }
 0x2f6   : > { %v1295_v24 = vsub.f32 %v1199_v6, %v1279_v13  ;;  %v1151_v51 = vadd.f32 %v1126_v12, %v1023_v7  ;;  %2468 = vpow2.f32 %v763_v8  ;;  %v1237_v13 = vld [vmem:[#allocation3 + $0x48] sm:$0xff]  ;;  %v1214_v12 = vld [vmem:[#allocation2 + $0x10] sm:$0xff] }
 0x2f7   : > { %2470 = vpow2.f32 %v779_v19 }
 0x2f8   : > { %1313 = vst.msk [vmem:[%s3206_s18 + $0x18] sm:$0xff] %vm409_vm1, %v1295_v24  ;;  %1167 = vst.msk [vmem:[#allocation4 + $0x30] sm:$0xff] %vm409_vm1, %v1151_v51 }
 0x2f9   : > { %v936_v22 = vpop.xlane.xlu0 %935 }
 0x2fa   : > { %v965_v44 = vadd.f32 %v936_v22, %v789_v1 }
 0x2fc   : > { %982 = vst.msk [vmem:[#allocation3 + $0x10] sm:$0xff] %vm409_vm1, %v965_v44  ;;  %v736_v44 = vld [vmem:[#allocation3 + $0x68] sm:$0xff] }
 0x2fd   : > { %v2463_v43 = vpop.eup %2462  ;;  %v952_v2 = vpop.xlane.xlu0 %951 }
 0x2fe   : > { %v1257_v55 = vmul.f32 0.6931472, %v2463_v43  ;;  %v973_v11 = vadd.f32 %v952_v2, %v797_v27  ;;  %v2465_v25 = vpop.eup %2464 }
 0x2ff   : > { %v1202_v3 = vld [vmem:[#allocation4 + $0x30] sm:$0xff]  ;;  %v788_v21 = vmul.f32 %v2465_v25, %v724_v58  ;;  %v2467_v17 = vpop.eup %2466 }
 0x300   : > { %v1282_v50 = vadd.f32 %v1257_v55, %v1218_v48  ;;  %990 = vst.msk [vmem:[#allocation3 + $0x50] sm:$0xff] %vm409_vm1, %v973_v11  ;;  %v801_v40 = vmul.f32 %v2467_v17, %v737_v28  ;;  %v2469_v47 = vpop.eup %2468 }
 0x301   : > { %v948_v34 = vpop.xlane.xlu0 %947  ;;  %v791_v20 = vmul.f32 %v2469_v47, %v727_v60  ;;  %v2471_v63 = vpop.eup %2470 }
 0x302   : > { %v1298_v37 = vsub.f32 %v1202_v3, %v1282_v50  ;;  %v971_v9 = vadd.f32 %v948_v34, %v795_v36  ;;  %v799_v54 = vmul.f32 %v2471_v63, %v735_v62  ;;  %v1243_v3 = vld [vmem:[#allocation3 + $0x78] sm:$0xff] }
 0x303   : > { %v1230_v0 = vld [vmem:[#allocation3 + $0x10] sm:$0xff] }
 0x304   : > { %1316 = vst.msk [vmem:[%s3206_s18 + $0x30] sm:$0xff] %vm409_vm1, %v1298_v37  ;;  %2472 = vlog2.f32 %v1230_v0  ;;  %988 = vst.msk [vmem:[#allocation3 + $0x40] sm:$0xff] %vm409_vm1, %v971_v9  ;;  %v1025_v9 = vld [vmem:[#allocation4 + $0x40] sm:$0xff] }
 0x305   : > { %v934_v49 = vpop.xlane.xlu0 %933  ;;  %2474 = vpow2.f32 %v769_v32  ;;  %v1028_v32 = vld [vmem:[#allocation4 + $0x58] sm:$0xff] }
 0x306   : > { %v964_v57 = vadd.f32 %v934_v49, %v788_v21  ;;  %2476 = vpow2.f32 %v781_v45  ;;  %v1197_v21 = vld [vmem:[#allocation4 + $0x8] sm:$0xff] }
 0x307   : > { %2478 = vpow2.f32 %v765_v46  ;;  %v1238_v55 = vld [vmem:[#allocation3 + $0x50] sm:$0xff] }
 0x308   : > { %981 = vst.msk [vmem:[#allocation3 + $0x8] sm:$0xff] %vm409_vm1, %v964_v57  ;;  %v1027_v46 = vld [vmem:[#allocation4 + $0x50] sm:$0xff] }
 0x309   : > { %v960_v56 = vpop.xlane.xlu0 %959 }
 0x30a   : > { %v977_v38 = vadd.f32 %v960_v56, %v801_v40  ;;  %v1030_v56 = vld [vmem:[#allocation4 + $0x68] sm:$0xff] }
 0x30b   : > { %v1236_v22 = vld [vmem:[#allocation3 + $0x40] sm:$0xff] }
 0x30c   : > { %994 = vst.msk [vmem:[#allocation3 + $0x70] sm:$0xff] %vm409_vm1, %v977_v38 }
 0x30d   : > { %v940_v5 = vpop.xlane.xlu0 %939 }
 0x30e   : > { %v2473_v4 = vpop.eup %2472  ;;  %v967_v7 = vadd.f32 %v940_v5, %v791_v20  ;;  %v1221_v20 = vld [vmem:[#allocation2 + $0x48] sm:$0xff] }
 0x30f   : > { %v1249_v52 = vmul.f32 0.6931472, %v2473_v4  ;;  %v1229_v6 = vld [vmem:[#allocation3 + $0x8] sm:$0xff]  ;;  %v2475_v24 = vpop.eup %2474 }
 0x310   : > { %2480 = vlog2.f32 %v1229_v6  ;;  %984 = vst.msk [vmem:[#allocation3 + $0x20] sm:$0xff] %vm409_vm1, %v967_v7  ;;  %v2477_v1 = vpop.eup %2476  ;;  %v794_v18 = vmul.f32 %v2475_v24, %v730_v23  ;;  %v1216_v24 = vld [vmem:[#allocation2 + $0x20] sm:$0xff] }
 0x311   : > { %v1278_v51 = vadd.f32 %v1249_v52, %v1214_v12  ;;  %v956_v15 = vpop.xlane.xlu0 %955  ;;  %2482 = vlog2.f32 %v1237_v13  ;;  %v2479_v27 = vpop.eup %2478  ;;  %v800_v2 = vmul.f32 %v2477_v1, %v736_v44  ;;  %v1220_v23 = vld [vmem:[#allocation2 + $0x40] sm:$0xff] }
 0x312   : > { %v975_v53 = vadd.f32 %v956_v15, %v799_v54  ;;  %2484 = vlog2.f32 %v1236_v22  ;;  %v792_v41 = vmul.f32 %v2479_v27, %v728_v39  ;;  %v1029_v54 = vld [vmem:[#allocation4 + $0x60] sm:$0xff]  ;;  %v1032_v15 = vld [vmem:[#allocation4 + $0x78] sm:$0xff] }
 0x313   : > { %v1294_v8 = vsub.f32 %v1198_v14, %v1278_v51  ;;  %2486 = vlog2.f32 %v1239_v16  ;;  %v1242_v29 = vld [vmem:[#allocation3 + $0x70] sm:$0xff]  ;;  %v1200_v44 = vld [vmem:[#allocation4 + $0x20] sm:$0xff] }
 0x314   : > { %992 = vst.msk [vmem:[#allocation3 + $0x60] sm:$0xff] %vm409_vm1, %v975_v53  ;;  %v1223_v53 = vld [vmem:[#allocation2 + $0x58] sm:$0xff] }
 0x315   : > { %1312 = vst.msk [vmem:[%s3206_s18 + $0x10] sm:$0xff] %vm409_vm1, %v1294_v8  ;;  %v946_v43 = vpop.xlane.xlu0 %945 }
 0x316   : > { %v970_v11 = vadd.f32 %v946_v43, %v794_v18  ;;  %v958_v48 = vpop.xlane.xlu1 %957 }
 0x317   : > { %v1232_v35 = vld [vmem:[#allocation3 + $0x20] sm:$0xff]  ;;  %v976_v19 = vadd.f32 %v958_v48, %v800_v2  ;;  %v1031_v48 = vld [vmem:[#allocation4 + $0x70] sm:$0xff] }
 0x318   : > { %2488 = vlog2.f32 %v1232_v35  ;;  %987 = vst.msk [vmem:[#allocation3 + $0x38] sm:$0xff] %vm409_vm1, %v970_v11 }
 0x319   : > { %2490 = vlog2.f32 %v1238_v55  ;;  %993 = vst.msk [vmem:[#allocation3 + $0x68] sm:$0xff] %vm409_vm1, %v976_v19  ;;  %v942_v10 = vpop.xlane.xlu0 %941 }
 0x31a   : > { %v2481_v50 = vpop.eup %2480  ;;  %v968_v36 = vadd.f32 %v942_v10, %v792_v41  ;;  %v1132_v25 = vpop.xlane.xlu1 %1131  ;;  %v1222_v10 = vld [vmem:[#allocation2 + $0x50] sm:$0xff] }
 0x31b   : > { %v1247_v34 = vmul.f32 0.6931472, %v2481_v50  ;;  %v1240_v58 = vld [vmem:[#allocation3 + $0x60] sm:$0xff]  ;;  %v1154_v37 = vadd.f32 %v1132_v25, %v1026_v59  ;;  %v2483_v33 = vpop.eup %2482 }
 0x31c   : > { %985 = vst.msk [vmem:[#allocation3 + $0x28] sm:$0xff] %vm409_vm1, %v968_v36  ;;  %2492 = vlog2.f32 %v1240_v58  ;;  %v2485_v28 = vpop.eup %2484  ;;  %v1263_v42 = vmul.f32 0.6931472, %v2483_v33 }
 0x31d   : > { %v1277_v0 = vadd.f32 %v1247_v34, %v1213_v26  ;;  %1170 = vst.msk [vmem:[#allocation4 + $0x48] sm:$0xff] %vm409_vm1, %v1154_v37  ;;  %v1130_v45 = vpop.xlane.xlu0 %1129  ;;  %2494 = vlog2.f32 %v1243_v3  ;;  %v2487_v40 = vpop.eup %2486  ;;  %v1261_v63 = vmul.f32 0.6931472, %v2485_v28  ;;  %v1227_v28 = vld [vmem:[#allocation2 + $0x78] sm:$0xff] }
 0x31e   : > { %v1153_v17 = vadd.f32 %v1130_v45, %v1025_v9  ;;  %v1136_v49 = vpop.xlane.xlu1 %1135  ;;  %2496 = vlog2.f32 %v1242_v29  ;;  %v1285_v52 = vadd.f32 %v1263_v42, %v1221_v20  ;;  %v1267_v6 = vmul.f32 0.6931472, %v2487_v40  ;;  %v1219_v29 = vld [vmem:[#allocation2 + $0x38] sm:$0xff]  ;;  %v1225_v45 = vld [vmem:[#allocation2 + $0x68] sm:$0xff] }
 0x31f   : > { %v1293_v57 = vsub.f32 %v1197_v21, %v1277_v0  ;;  %v1235_v61 = vld [vmem:[#allocation3 + $0x38] sm:$0xff]  ;;  %v1156_v30 = vadd.f32 %v1136_v49, %v1028_v32  ;;  %v1284_v16 = vadd.f32 %v1261_v63, %v1220_v23  ;;  %v1224_v21 = vld [vmem:[#allocation2 + $0x60] sm:$0xff] }
 0x320   : > { %2498 = vlog2.f32 %v1235_v61  ;;  %v1241_v47 = vld [vmem:[#allocation3 + $0x68] sm:$0xff]  ;;  %1169 = vst.msk [vmem:[#allocation4 + $0x40] sm:$0xff] %vm409_vm1, %v1153_v17  ;;  %v1287_v55 = vadd.f32 %v1267_v6, %v1223_v53  ;;  %v3289_v53 = vld [vmem:[%s3909_s3] sm:$0xff] (%p1326_p2) }
 0x321   : > { %1311 = vst.msk [vmem:[%s3206_s18 + $0x8] sm:$0xff] %vm409_vm1, %v1293_v57  ;;  %2500 = vlog2.f32 %v1241_v47  ;;  %1172 = vst.msk [vmem:[#allocation4 + $0x58] sm:$0xff] %vm409_vm1, %v1156_v30  ;;  %v1134_v60 = vpop.xlane.xlu0 %1133  ;;  %v1203_v57 = vld [vmem:[#allocation4 + $0x38] sm:$0xff] }
 0x322   : > { %v2489_v38 = vpop.eup %2488  ;;  %v1155_v5 = vadd.f32 %v1134_v60, %v1027_v46  ;;  %v1140_v62 = vpop.xlane.xlu1 %1139 }
 0x323   : > { %v2491_v4 = vpop.eup %2490  ;;  %v1253_v7 = vmul.f32 0.6931472, %v2489_v38  ;;  %v1233_v13 = vld [vmem:[#allocation3 + $0x28] sm:$0xff]  ;;  %v1158_v12 = vadd.f32 %v1140_v62, %v1030_v56  ;;  %v1226_v62 = vld [vmem:[#allocation2 + $0x70] sm:$0xff] }
 0x324   : > { %2502 = vlog2.f32 %v1233_v13  ;;  %v1205_v51 = vld [vmem:[#allocation4 + $0x48] sm:$0xff]  ;;  %1171 = vst.msk [vmem:[#allocation4 + $0x50] sm:$0xff] %vm409_vm1, %v1155_v5  ;;  %v1265_v8 = vmul.f32 0.6931472, %v2491_v4 }
 0x325   : > { %v1280_v1 = vadd.f32 %v1253_v7, %v1216_v24  ;;  %v1301_v14 = vsub.f32 %v1205_v51, %v1285_v52  ;;  %1174 = vst.msk [vmem:[#allocation4 + $0x68] sm:$0xff] %vm409_vm1, %v1158_v12  ;;  %v1138_v22 = vpop.xlane.xlu0 %1137  ;;  %v1217_v38 = vld [vmem:[#allocation2 + $0x28] sm:$0xff]  ;;  %v3281_v24 = vld [vmem:[%s3909_s3 + $0x10] sm:$0xff] (%p1326_p2)  ;;  %v2649_v51 = vmov (%p1326_p2), 0  }
 0x326   : > { %v1157_v18 = vadd.f32 %v1138_v22, %v1029_v54  ;;  %v1144_v27 = vpop.xlane.xlu1 %1143  ;;  %v2493_v43 = vpop.eup %2492  ;;  %v1286_v3 = vadd.f32 %v1265_v8, %v1222_v10  ;;  %v1201_v13 = vld [vmem:[#allocation4 + $0x28] sm:$0xff]  ;;  %2505 = vset.pattern.permute.xlu1 (%p1326_p2), %v2649_v51  ;;  %2504 = vset.pattern.permute.xlu0 (%p1326_p2), %v2649_v51 }
 0x327   : > { %v1296_v2 = vsub.f32 %v1200_v44, %v1280_v1  ;;  %1319 = vst.msk [vmem:[%s3206_s18 + $0x48] sm:$0xff] %vm409_vm1, %v1301_v14  ;;  %v1204_v39 = vld [vmem:[#allocation4 + $0x40] sm:$0xff]  ;;  %v1160_v11 = vadd.f32 %v1144_v27, %v1032_v15  ;;  %v2495_v35 = vpop.eup %2494  ;;  %v1269_v34 = vmul.f32 0.6931472, %v2493_v43  ;;  %1870 = vperm.xlu1 (%p1326_p2), %2505, %v3281_v24   ;;  %1860 = vperm.xlu0 (%p1326_p2), %2504, %v3289_v53   ;;  %v3309_v10 = vld [vmem:[%s3909_s3 + $0x8] sm:$0xff] (%p1326_p2) }
 0x328   : > { %v1300_v19 = vsub.f32 %v1204_v39, %v1284_v16  ;;  %v1207_v41 = vld [vmem:[#allocation4 + $0x58] sm:$0xff]  ;;  %1173 = vst.msk [vmem:[#allocation4 + $0x60] sm:$0xff] %vm409_vm1, %v1157_v18  ;;  %v2497_v59 = vpop.eup %2496  ;;  %v1275_v26 = vmul.f32 0.6931472, %v2495_v35 }
 0x329   : > { %1314 = vst.msk [vmem:[%s3206_s18 + $0x20] sm:$0xff] %vm409_vm1, %v1296_v2  ;;  %v1303_v50 = vsub.f32 %v1207_v41, %v1287_v55  ;;  %1176 = vst.msk [vmem:[#allocation4 + $0x78] sm:$0xff] %vm409_vm1, %v1160_v11  ;;  %v1142_v36 = vpop.xlane.xlu0 %1141  ;;  %v1288_v42 = vadd.f32 %v1269_v34, %v1224_v21  ;;  %v1273_v30 = vmul.f32 0.6931472, %v2497_v59  ;;  %v3300_v39 = vld [vmem:[%s3909_s3 + $0x18] sm:$0xff] (%p1326_p2)  ;;  %v3328_v21 = vld [vmem:[%s3909_s3 + $0x20] sm:$0xff] (%p1326_p2) }
 0x32a   : > { %v2499_v25 = vpop.eup %2498  ;;  %1318 = vst.msk [vmem:[%s3206_s18 + $0x40] sm:$0xff] %vm409_vm1, %v1300_v19  ;;  %v1159_v58 = vadd.f32 %v1142_v36, %v1031_v48  ;;  %v1291_v60 = vadd.f32 %v1275_v26, %v1227_v28 }
 0x32b   : > { %v2501_v37 = vpop.eup %2500  ;;  %v1259_v9 = vmul.f32 0.6931472, %v2499_v25  ;;  %1321 = vst.msk [vmem:[%s3206_s18 + $0x58] sm:$0xff] %vm409_vm1, %v1303_v50  ;;  %v1206_v33 = vld [vmem:[#allocation4 + $0x50] sm:$0xff]  ;;  %v1290_v52 = vadd.f32 %v1273_v30, %v1226_v62  ;;  %1875 = vperm.xlu1 (%p1326_p2), %2505, %v3300_v39   ;;  %1865 = vperm.xlu0 (%p1326_p2), %2504, %v3309_v10   ;;  %v3337_v30 = vld [vmem:[%s3909_s3 + $0x38] sm:$0xff] (%p1326_p2) }
 0x32c   : > { %v1302_v32 = vsub.f32 %v1206_v33, %v1286_v3  ;;  %v1271_v0 = vmul.f32 0.6931472, %v2501_v37  ;;  %1175 = vst.msk [vmem:[#allocation4 + $0x70] sm:$0xff] %vm409_vm1, %v1159_v58  ;;  %v1209_v47 = vld [vmem:[#allocation4 + $0x68] sm:$0xff] }
 0x32d   : > { %v1283_v17 = vadd.f32 %v1259_v9, %v1219_v29  ;;  %v3318_v37 = vld [vmem:[%s3909_s3 + $0x28] sm:$0xff] (%p1326_p2) }
 0x32e   : > { %v2503_v49 = vpop.eup %2502  ;;  %1320 = vst.msk [vmem:[%s3206_s18 + $0x50] sm:$0xff] %vm409_vm1, %v1302_v32  ;;  %v1289_v61 = vadd.f32 %v1271_v0, %v1225_v45 }
 0x32f   : > { %v1299_v46 = vsub.f32 %v1203_v57, %v1283_v17  ;;  %v1255_v40 = vmul.f32 0.6931472, %v2503_v49  ;;  %v1208_v56 = vld [vmem:[#allocation4 + $0x60] sm:$0xff]  ;;  %1885 = vperm.xlu1 (%p1326_p2), %2505, %v3318_v37   ;;  %1880 = vperm.xlu0 (%p1326_p2), %2504, %v3328_v21  }
 0x330   : > { %v1305_v20 = vsub.f32 %v1209_v47, %v1289_v61  ;;  %v1304_v63 = vsub.f32 %v1208_v56, %v1288_v42  ;;  %v1211_v5 = vld [vmem:[#allocation4 + $0x78] sm:$0xff]  ;;  %1330 = sbr.rel (!%p1326_p2) target bundleno = 1229 (0x4cd), region = 72 }
 0x331   : > { %1317 = vst.msk [vmem:[%s3206_s18 + $0x38] sm:$0xff] %vm409_vm1, %v1299_v46  ;;  %v1281_v4 = vadd.f32 %v1255_v40, %v1217_v38  ;;  %v1307_v7 = vsub.f32 %v1211_v5, %v1291_v60  ;;  %v3346_v60 = vld [vmem:[%s3909_s3 + $0x30] sm:$0xff] (%p1326_p2) }
 0x332   : > { %1323 = vst.msk [vmem:[%s3206_s18 + $0x68] sm:$0xff] %vm409_vm1, %v1305_v20  ;;  %1322 = vst.msk [vmem:[%s3206_s18 + $0x60] sm:$0xff] %vm409_vm1, %v1304_v63  ;;  %v1385_v20 = vld [vmem:[%s3908_s2 + $0x10] sm:$0xff] (%p1326_p2)  ;;  %v3351_v63 = vstv (%p1326_p2), %s1495_s16 }
 0x333   : > { %v1297_v6 = vsub.f32 %v1201_v13, %v1281_v4  ;;  %1325 = vst.msk [vmem:[%s3206_s18 + $0x78] sm:$0xff] %vm409_vm1, %v1307_v7  ;;  %v1210_v12 = vld [vmem:[#allocation4 + $0x70] sm:$0xff]  ;;  %1895 = vperm.xlu1 (%p1326_p2), %2505, %v3337_v30   ;;  %1890 = vperm.xlu0 (%p1326_p2), %2504, %v3346_v60   ;;  %v3355_v13 = vstv (%p1326_p2), %s1496_s17 }
 0x334   : > { %v1306_v54 = vsub.f32 %v1210_v12, %v1290_v52  ;;  %v3358_v52 = vstv (%p1326_p2), %s3312_s25  ;;  %v3366_v12 = vld [vmem:[%s3909_s3 + $0x40] sm:$0xff] (%p1326_p2) }
 0x335   : > { %1315 = vst.msk [vmem:[%s3206_s18 + $0x28] sm:$0xff] %vm409_vm1, %v1297_v6  ;;  %v1383_v6 = vld [vmem:[%s3908_s2] sm:$0xff] (%p1326_p2) }
 0x336   : > { %1324 = vst.msk [vmem:[%s3206_s18 + $0x70] sm:$0xff] %vm409_vm1, %v1306_v54 }
 0x337   : > { %1900 = vperm.xlu0 %2504, %v3366_v12  }
 0x33d   : > { %v1335_v15 = vld [vmem:[#allocation5 + $0x10] sm:$0xff]  ;;  %v1333_v44 = vld [vmem:[#allocation5] sm:$0xff]  ;;  %v1336_v55 = vld [vmem:[#allocation5 + $0x18] sm:$0xff] }
 0x33e   : > { %v1352_v23 = vld [vmem:[#allocation5 + $0x90] sm:$0xff]  ;;  %v1350_v16 = vld [vmem:[#allocation5 + $0x80] sm:$0xff]  ;;  %v1353_v11 = vld [vmem:[#allocation5 + $0x98] sm:$0xff] }
 0x33f   : > { %v1369_v1 = vld [vmem:[#allocation5 + $0x110] sm:$0xff]  ;;  %v1449_v14 = vsub.f32 %v1335_v15, %v1352_v23  ;;  %v1367_v8 = vld [vmem:[#allocation5 + $0x100] sm:$0xff]  ;;  %v1447_v43 = vsub.f32 %v1333_v44, %v1350_v16  ;;  %v1370_v19 = vld [vmem:[#allocation5 + $0x118] sm:$0xff]  ;;  %v1450_v41 = vsub.f32 %v1336_v55, %v1353_v11 }
 0x340   : > { %v3284_v22 = vsub.f32 %v1369_v1, %v1335_v15  ;;  %v3295_v2 = vsub.f32 %v1367_v8, %v1333_v44  ;;  %v3304_v59 = vsub.f32 %v1370_v19, %v1336_v55  ;;  %v1334_v36 = vld [vmem:[#allocation5 + $0x8] sm:$0xff]  ;;  %v1337_v49 = vld [vmem:[#allocation5 + $0x20] sm:$0xff]  ;;  %v1340_v47 = vld [vmem:[#allocation5 + $0x38] sm:$0xff] }
 0x341   : > { %v1467_v18 = vmul.f32 1.442695, %v1449_v14  ;;  %v1463_v48 = vmul.f32 1.442695, %v1447_v43  ;;  %v1469_v50 = vmul.f32 1.442695, %v1450_v41 }
 0x342   : > { %v1551_v27 = vmul.f32 1.442695, %v3284_v22  ;;  %v1547_v35 = vmul.f32 1.442695, %v3295_v2  ;;  %v1351_v25 = vld [vmem:[#allocation5 + $0x88] sm:$0xff]  ;;  %v1354_v28 = vld [vmem:[#allocation5 + $0xa0] sm:$0xff] }
 0x343   : > { %2506 = vpow2.f32 %v1467_v18  ;;  %v1368_v3 = vld [vmem:[#allocation5 + $0x108] sm:$0xff]  ;;  %v1553_v34 = vmul.f32 1.442695, %v3304_v59  ;;  %v1448_v58 = vsub.f32 %v1334_v36, %v1351_v25  ;;  %v1371_v57 = vld [vmem:[#allocation5 + $0x120] sm:$0xff]  ;;  %v1451_v42 = vsub.f32 %v1337_v49, %v1354_v28  ;;  %v1357_v56 = vld [vmem:[#allocation5 + $0xb8] sm:$0xff] }
 0x344   : > { %2508 = vpow2.f32 %v1551_v27  ;;  %v3320_v9 = vsub.f32 %v1368_v3, %v1334_v36  ;;  %v1338_v33 = vld [vmem:[#allocation5 + $0x28] sm:$0xff]  ;;  %v3340_v40 = vsub.f32 %v1371_v57, %v1337_v49  ;;  %v1374_v62 = vld [vmem:[#allocation5 + $0x138] sm:$0xff]  ;;  %v1454_v23 = vsub.f32 %v1340_v47, %v1357_v56 }
 0x345   : > { %2510 = vpow2.f32 %v1463_v48  ;;  %v1355_v26 = vld [vmem:[#allocation5 + $0xa8] sm:$0xff]  ;;  %v1465_v32 = vmul.f32 1.442695, %v1448_v58  ;;  %v1471_v5 = vmul.f32 1.442695, %v1451_v42  ;;  %v3372_v8 = vsub.f32 %v1374_v62, %v1340_v47 }
 0x346   : > { %2512 = vpow2.f32 %v1547_v35  ;;  %v1372_v29 = vld [vmem:[#allocation5 + $0x128] sm:$0xff]  ;;  %v1452_v0 = vsub.f32 %v1338_v33, %v1355_v26  ;;  %v1549_v17 = vmul.f32 1.442695, %v3320_v9  ;;  %v1555_v15 = vmul.f32 1.442695, %v3340_v40 }
 0x347   : > { %2514 = vpow2.f32 %v1469_v50  ;;  %v3323_v45 = vsub.f32 %v1372_v29, %v1338_v33  ;;  %v3381_v41 = vld [vmem:[%s3909_s3 + $0x48] sm:$0xff]  ;;  %v1477_v25 = vmul.f32 1.442695, %v1454_v23  ;;  %v1561_v62 = vmul.f32 1.442695, %v3372_v8  ;;  %v3411_v23 = vld [vmem:[#allocation5 + $0x30] sm:$0xff] }
 0x348   : > { %2516 = vpow2.f32 %v1553_v34  ;;  %v1473_v61 = vmul.f32 1.442695, %v1452_v0  ;;  %1905 = vperm.xlu0 %2504, %v3381_v41  }
 0x349   : > { %2518 = vpow2.f32 %v1465_v32  ;;  %v1557_v46 = vmul.f32 1.442695, %v3323_v45 }
 0x34a   : > { %2520 = vpow2.f32 %v1549_v17 }
 0x34b   : > { %2522 = vpow2.f32 %v1473_v61  ;;  %v3398_v61 = vld [vmem:[%s3909_s3 + $0x50] sm:$0xff] }
 0x34c   : > { %2524 = vpow2.f32 %v1557_v46  ;;  %1910 = vperm.xlu0 %2504, %v3398_v61  }
 0x34d   : > { %v2507_v38 = vpop.eup %2506  ;;  %2526 = vpow2.f32 %v1471_v5  ;;  %v1384_v5 = vld [vmem:[%s3908_s2 + $0x8] sm:$0xff] }
 0x34e   : > { %v2509_v4 = vpop.eup %2508  ;;  %v1500_v7 = vmax.f32 %v3351_v63, %v2507_v38  ;;  %v1613_v44 = vmul.f32 %v2507_v38, %v1385_v20  ;;  %2528 = vpow2.f32 %v1555_v15 }
 0x34f   : > { %v2511_v54 = vpop.eup %2510  ;;  %v1581_v51 = vsub.f32 %v2509_v4, %v3284_v22  ;;  %2530 = vpow2.f32 %v1477_v25 }
 0x350   : > { %v2513_v1 = vpop.eup %2512  ;;  %v1517_v14 = vmin.f32 %v3355_v13, %v1500_v7  ;;  %v1498_v16 = vmax.f32 %v3351_v63, %v2511_v54  ;;  %v1611_v55 = vmul.f32 %v2511_v54, %v1383_v6  ;;  %2532 = vpow2.f32 %v1561_v62 }
 0x351   : > { %v2515_v18 = vpop.eup %2514  ;;  %v2276_v27 = vadd.f32 -1.0, %v1581_v51  ;;  %v1579_v43 = vsub.f32 %v2513_v1, %v3295_v2  ;;  %v1386_v2 = vld [vmem:[%s3908_s2 + $0x18] sm:$0xff]  ;;  %v3413_v1 = vld [vmem:[#allocation5 + $0xb0] sm:$0xff] }
 0x352   : > { %v2517_v22 = vpop.eup %2516  ;;  %v1629_v11 = vmul.f32 %v1517_v14, %v1385_v20  ;;  %v2000_v48 = vsub.f32 %v2507_v38, %v1517_v14  ;;  %v1515_v35 = vmin.f32 %v3355_v13, %v1498_v16  ;;  %v1501_v19 = vmax.f32 %v3351_v63, %v2515_v18  ;;  %v1415_v38 = vld [vmem:[%s3910_s4] sm:$0xff] }
 0x353   : > { %v2274_v50 = vadd.f32 -1.0, %v1579_v43  ;;  %v1582_v36 = vsub.f32 %v2517_v22, %v3304_v59  ;;  %v3387_v3 = vpop.eup %2518  ;;  %v1662_v34 = vmul.f32 %v2276_v27, %v3358_v52  ;;  %v1614_v57 = vmul.f32 %v2515_v18, %v1386_v2  ;;  %v1417_v43 = vld [vmem:[%s3910_s4 + $0x10] sm:$0xff] }
 0x354   : > { %v2016_v58 = vand.u32 2147483647, %v2000_v48  ;;  %v1627_v33 = vmul.f32 %v1515_v35, %v1383_v6  ;;  %v1998_v26 = vsub.f32 %v2511_v54, %v1515_v35  ;;  %v1645_v29 = vmin.f32 %v1613_v44, %v1629_v11  ;;  %v2521_v42 = vpop.eup %2520 }
 0x355   : > { %v1660_v32 = vmul.f32 %v2274_v50, %v3358_v52  ;;  %v1518_v0 = vmin.f32 %v3355_v13, %v1501_v19  ;;  %v1499_v17 = vmax.f32 %v3351_v63, %v3387_v3  ;;  %v2277_v28 = vadd.f32 -1.0, %v1582_v36  ;;  %v3400_v56 = vpop.eup %2522  ;;  %v1418_v36 = vld [vmem:[%s3910_s4 + $0x18] sm:$0xff] }
 0x356   : > { %v1643_v59 = vmin.f32 %v1611_v55, %v1627_v33  ;;  %v2014_v49 = vand.u32 2147483647, %v1998_v26  ;;  %vm2032_vm3 = vcmp.gt.f32.partialorder %v2016_v58, 1e-06  ;;  %v2525_v4 = vpop.eup %2524  ;;  %v1678_v7 = vsub.f32 %v1645_v29, %v1662_v34 }
 0x357   : > { %v1630_v46 = vmul.f32 %v1518_v0, %v1386_v2  ;;  %v2001_v47 = vsub.f32 %v2515_v18, %v1518_v0  ;;  %v2650_v6 = vmov 0.0   ;;  %v1516_v15 = vmin.f32 %v3355_v13, %v1499_v17  ;;  %v3419_v27 = vpop.eup %2526 }
 0x358   : > { %v1676_v20 = vsub.f32 %v1643_v59, %v1660_v32  ;;  %vm2030_vm4 = vcmp.gt.f32.partialorder %v2014_v49, 1e-06  ;;  %v2292_v14 = vsel %vm2032_vm3, 1.0, %v2650_v6  ;;  %v1663_v18 = vmul.f32 %v2277_v28, %v3358_v52  ;;  %v2529_v50 = vpop.eup %2528  ;;  %v3448_v49 = vld [vmem:[%s3909_s3 + $0x58] sm:$0xff] }
 0x359   : > { %v2290_v54 = vsel %vm2030_vm4, 1.0, %v2650_v6  ;;  %v2017_v51 = vand.u32 2147483647, %v2001_v47  ;;  %v1646_v16 = vmin.f32 %v1614_v57, %v1630_v46  ;;  %v1580_v22 = vsub.f32 %v2521_v42, %v3320_v9 }
 0x35a   : > { %v1692_v44 = vsub.f32 0.0, %v1676_v20  ;;  %v2078_v55 = vmul.f32 %v2290_v54, %v1415_v38  ;;  %v1612_v11 = vmul.f32 %v3387_v3, %v1384_v5  ;;  %v1628_v35 = vmul.f32 %v1516_v15, %v1384_v5  ;;  %v3458_v5 = vpop.eup %2530 }
 0x35b   : > { %vm2033_vm5 = vcmp.gt.f32.partialorder %v2017_v51, 1e-06  ;;  %v1453_v19 = vsub.f32 %v3411_v23, %v3413_v1  ;;  %v1694_v2 = vsub.f32 0.0, %v1678_v7  ;;  %v2275_v34 = vadd.f32 -1.0, %v1580_v22 }
 0x35c   : > { %v1708_v48 = vmul.f32 %v1692_v44, %v3289_v53  ;;  %v2293_v25 = vsel %vm2033_vm5, 1.0, %v2650_v6  ;;  %v1999_v9 = vsub.f32 %v3387_v3, %v1516_v15  ;;  %v2080_v58 = vmul.f32 %v2292_v14, %v1417_v43  ;;  %v1388_v53 = vld [vmem:[%s3908_s2 + $0x28] sm:$0xff]  ;;  %v1387_v3 = vld [vmem:[%s3908_s2 + $0x20] sm:$0xff] }
 0x35d   : > { %v1644_v33 = vmin.f32 %v1612_v11, %v1628_v35  ;;  %v1503_v26 = vmax.f32 %v3351_v63, %v3400_v56  ;;  %v1584_v29 = vsub.f32 %v2525_v4, %v3323_v45  ;;  %v2094_v32 = vsel %vm409_vm1, %v2078_v55, 0.0  ;;  %v1416_v45 = vld [vmem:[%s3910_s4 + $0x8] sm:$0xff]  ;;  %v3468_v14 = vld [vmem:[%s3909_s3 + $0x60] sm:$0xff] }
 0x35e   : > { %1726 = vperm.xlu0 %2504, %v1708_v48   ;;  %v1679_v0 = vsub.f32 %v1646_v16, %v1663_v18  ;;  %v1661_v17 = vmul.f32 %v2275_v34, %v3358_v52  ;;  %v2015_v59 = vand.u32 2147483647, %v1999_v9  ;;  %v2081_v28 = vmul.f32 %v2293_v25, %v1418_v36  ;;  %v3475_v48 = vpop.eup %2532  ;;  %v3488_v9 = vld [vmem:[%s3909_s3 + $0x68] sm:$0xff] }
 0x35f   : > { %v1520_v57 = vmin.f32 %v3355_v13, %v1503_v26  ;;  %v1502_v42 = vmax.f32 %v3351_v63, %v3419_v27  ;;  %v1583_v46 = vsub.f32 %v2529_v50, %v3340_v40  ;;  %v2279_v38 = vadd.f32 -1.0, %v1584_v29 }
 0x360   : > { %v1677_v47 = vsub.f32 %v1644_v33, %v1661_v17  ;;  %vm2031_vm6 = vcmp.gt.f32.partialorder %v2015_v59, 1e-06  ;;  %v1616_v20 = vmul.f32 %v3400_v56, %v1388_v53  ;;  %v1615_v54 = vmul.f32 %v3419_v27, %v1387_v3  ;;  %v1358_v17 = vld [vmem:[#allocation5 + $0xc0] sm:$0xff] }
 0x361   : > { %v2291_v62 = vsel %vm2031_vm6, 1.0, %v2650_v6  ;;  %v1632_v4 = vmul.f32 %v1520_v57, %v1388_v53  ;;  %v2003_v7 = vsub.f32 %v3400_v56, %v1520_v57  ;;  %v1519_v40 = vmin.f32 %v3355_v13, %v1502_v42 }
 0x362   : > { %1915 = vperm.xlu0 %2504, %v3448_v49   ;;  %v1693_v51 = vsub.f32 0.0, %v1677_v47  ;;  %v2079_v15 = vmul.f32 %v2291_v62, %v1416_v45  ;;  %v2278_v1 = vadd.f32 -1.0, %v1583_v46  ;;  %v1710_v44 = vmul.f32 %v1694_v2, %v3281_v24  ;;  %v1420_v24 = vld [vmem:[%s3910_s4 + $0x28] sm:$0xff] }
 0x363   : > { %v2097_v16 = vsel %vm409_vm1, %v2080_v58, 0.0  ;;  %v1695_v18 = vsub.f32 0.0, %v1679_v0  ;;  %v2019_v56 = vand.u32 2147483647, %v2003_v7  ;;  %v1631_v22 = vmul.f32 %v1519_v40, %v1387_v3  ;;  %v1341_v0 = vld [vmem:[#allocation5 + $0x40] sm:$0xff]  ;;  %v1342_v62 = vld [vmem:[#allocation5 + $0x48] sm:$0xff] }
 0x364   : > { %v1709_v43 = vmul.f32 %v1693_v51, %v3309_v10  ;;  %v2095_v55 = vsel %vm409_vm1, %v2079_v15, 0.0  ;;  %v1664_v11 = vmul.f32 %v2278_v1, %v3358_v52  ;;  %v2099_v35 = vsel %vm409_vm1, %v2081_v28, 0.0  ;;  %v1375_v28 = vld [vmem:[#allocation5 + $0x140] sm:$0xff]  ;;  %v1376_v51 = vld [vmem:[#allocation5 + $0x148] sm:$0xff]  ;;  %v1343_v15 = vld [vmem:[#allocation5 + $0x50] sm:$0xff] }
 0x365   : > { %v2096_v50 = vadd.f32 %v2095_v55, %v2094_v32  ;;  %vm2035_vm7 = vcmp.gt.f32.partialorder %v2019_v56, 1e-06  ;;  %v2002_v36 = vsub.f32 %v3419_v27, %v1519_v40  ;;  %v1648_v10 = vmin.f32 %v1616_v20, %v1632_v4  ;;  %v1419_v27 = vld [vmem:[%s3910_s4 + $0x20] sm:$0xff]  ;;  %v1373_v32 = vld [vmem:[#allocation5 + $0x130] sm:$0xff]  ;;  %v1359_v4 = vld [vmem:[#allocation5 + $0xc8] sm:$0xff] }
 0x366   : > { %1920 = vperm.xlu0 %2504, %v3468_v14   ;;  %v1665_v2 = vmul.f32 %v2279_v38, %v3358_v52  ;;  %v2295_v25 = vsel %vm2035_vm7, 1.0, %v2650_v6  ;;  %v1647_v34 = vmin.f32 %v1615_v54, %v1631_v22  ;;  %1731 = vperm.xlu1 %2505, %v1709_v43   ;;  %v1475_v53 = vmul.f32 1.442695, %v1453_v19  ;;  %v3501_v19 = vld [vmem:[%s3909_s3 + $0x70] sm:$0xff]  ;;  %v3525_v22 = vld [vmem:[%s3909_s3 + $0x78] sm:$0xff] }
 0x367   : > { %v2098_v58 = vadd.f32 %v2097_v16, %v2096_v50  ;;  %v2018_v33 = vand.u32 2147483647, %v2002_v36  ;;  %v1505_v29 = vmax.f32 %v3351_v63, %v3458_v5  ;;  %v2083_v59 = vmul.f32 %v2295_v25, %v1420_v24  ;;  %v1360_v40 = vld [vmem:[#allocation5 + $0xd0] sm:$0xff]  ;;  %v1361_v36 = vld [vmem:[#allocation5 + $0xd8] sm:$0xff] }
 0x368   : > { %v1680_v26 = vsub.f32 %v1647_v34, %v1664_v11  ;;  %v1711_v45 = vmul.f32 %v1695_v18, %v3300_v39  ;;  %v1681_v57 = vsub.f32 %v1648_v10, %v1665_v2  ;;  %2534 = vpow2.f32 %v1475_v53  ;;  %v1378_v10 = vld [vmem:[#allocation5 + $0x158] sm:$0xff]  ;;  %v1345_v2 = vld [vmem:[#allocation5 + $0x60] sm:$0xff] }
 0x369   : > { %vm2034_vm8 = vcmp.gt.f32.partialorder %v2018_v33, 1e-06  ;;  %v2100_v3 = vadd.f32 %v2099_v35, %v2098_v58  ;;  %v3504_v38 = vsub.f32 %v1373_v32, %v3411_v23  ;;  %v1455_v20 = vsub.f32 %v1341_v0, %v1358_v17  ;;  %v1377_v35 = vld [vmem:[#allocation5 + $0x150] sm:$0xff] }
 0x36a   : > { %1925 = vperm.xlu0 %2504, %v3488_v9   ;;  %v1696_v42 = vsub.f32 0.0, %v1680_v26  ;;  %v2294_v46 = vsel %vm2034_vm8, 1.0, %v2650_v6  ;;  %1736 = vperm.xlu1 %2505, %v1710_v44   ;;  %v3507_v39 = vmin.f32 %v3355_v13, %v1505_v29  ;;  %v1586_v7 = vsub.f32 %v3475_v48, %v3372_v8  ;;  %v1390_v8 = vld [vmem:[%s3908_s2 + $0x38] sm:$0xff] }
 0x36b   : > { %v2082_v47 = vmul.f32 %v2294_v46, %v1419_v27  ;;  %v3511_v54 = vsub.f32 %v1375_v28, %v1341_v0  ;;  %v2103_v1 = vsel %vm409_vm1, %v2083_v59, 0.0  ;;  %v1559_v23 = vmul.f32 1.442695, %v3504_v38  ;;  %v1362_v27 = vld [vmem:[#allocation5 + $0xe0] sm:$0xff] }
 0x36c   : > { %v1479_v16 = vmul.f32 1.442695, %v1455_v20  ;;  %v1697_v18 = vsub.f32 0.0, %v1681_v57  ;;  %v1712_v56 = vmul.f32 %v1696_v42, %v3328_v21  ;;  %v1456_v11 = vsub.f32 %v1342_v62, %v1359_v4  ;;  %v1344_v21 = vld [vmem:[#allocation5 + $0x58] sm:$0xff]  ;;  %v1379_v59 = vld [vmem:[#allocation5 + $0x160] sm:$0xff]  ;;  %v1363_v57 = vld [vmem:[#allocation5 + $0xe8] sm:$0xff] }
 0x36d   : > { %v2101_v44 = vsel %vm409_vm1, %v2082_v47, 0.0  ;;  %v1563_v55 = vmul.f32 1.442695, %v3511_v54  ;;  %2536 = vpow2.f32 %v1559_v23  ;;  %v3527_v48 = vsub.f32 %v1376_v51, %v1342_v62  ;;  %v1389_v42 = vld [vmem:[%s3908_s2 + $0x30] sm:$0xff]  ;;  %v1380_v4 = vld [vmem:[#allocation5 + $0x168] sm:$0xff] }
 0x36e   : > { %1930 = vperm.xlu0 %2504, %v3501_v19   ;;  %v2102_v43 = vadd.f32 %v2101_v44, %v2100_v3  ;;  %1741 = vperm.xlu1 %2505, %v1711_v45   ;;  %v1457_v50 = vsub.f32 %v1343_v15, %v1360_v40  ;;  %2538 = vpow2.f32 %v1479_v16  ;;  %v2281_v25 = vadd.f32 -1.0, %v1586_v7  ;;  %v1346_v45 = vld [vmem:[#allocation5 + $0x68] sm:$0xff] }
 0x36f   : > { %2540 = vpow2.f32 %v1563_v55  ;;  %v1481_v34 = vmul.f32 1.442695, %v1456_v11  ;;  %v1565_v58 = vmul.f32 1.442695, %v3527_v48  ;;  %v1713_v33 = vmul.f32 %v1697_v18, %v3318_v37 }
 0x370   : > { %v3529_v24 = vadd.f32 %v2103_v1, %v2102_v43  ;;  %v1618_v53 = vmul.f32 %v3458_v5, %v1390_v8  ;;  %v3535_v26 = vsub.f32 %v1377_v35, %v1343_v15  ;;  %v1458_v29 = vsub.f32 %v1344_v21, %v1361_v36 }
 0x371   : > { %v1634_v32 = vmul.f32 %v3507_v39, %v1390_v8  ;;  %2542 = vpow2.f32 %v1481_v34  ;;  %v1483_v0 = vmul.f32 1.442695, %v1457_v50  ;;  %v3538_v17 = vsub.f32 %v1378_v10, %v1344_v21  ;;  %v1391_v8 = vld [vmem:[%s3908_s2 + $0x40] sm:$0xff] }
 0x372   : > { %1935 = vperm.xlu0 %2504, %v3525_v22   ;;  %1746 = vperm.xlu1 %2505, %v1712_v56   ;;  %2544 = vpow2.f32 %v1565_v58  ;;  %v1567_v3 = vmul.f32 1.442695, %v3535_v26  ;;  %v1459_v28 = vsub.f32 %v1345_v2, %v1362_v27  ;;  %v3541_v37 = vpop.eup %2534  ;;  %v1485_v46 = vmul.f32 1.442695, %v1458_v29 }
 0x373   : > { %v1667_v47 = vmul.f32 %v2281_v25, %v3358_v52  ;;  %v1504_v20 = vmax.f32 %v3351_v63, %v3541_v37  ;;  %v3549_v62 = vsub.f32 %v1379_v59, %v1345_v2  ;;  %v1650_v7 = vmin.f32 %v1618_v53, %v1634_v32  ;;  %v1364_v53 = vld [vmem:[#allocation5 + $0xf0] sm:$0xff] }
 0x374   : > { %2546 = vpow2.f32 %v1483_v0  ;;  %v1569_v51 = vmul.f32 1.442695, %v3538_v17  ;;  %v1460_v15 = vsub.f32 %v1346_v45, %v1363_v57  ;;  %v1617_v1 = vmul.f32 %v3541_v37, %v1389_v42 }
 0x375   : > { %v3553_v40 = vmin.f32 %v3355_v13, %v1504_v20  ;;  %2548 = vpow2.f32 %v1567_v3  ;;  %v1487_v44 = vmul.f32 1.442695, %v1459_v28  ;;  %v3556_v16 = vsub.f32 %v1380_v4, %v1346_v45  ;;  %v1381_v28 = vld [vmem:[#allocation5 + $0x170] sm:$0xff] }
 0x376   : > { %1751 = vperm.xlu1 %2505, %v1713_v33   ;;  %2550 = vpow2.f32 %v1485_v46  ;;  %v1571_v55 = vmul.f32 1.442695, %v3549_v62  ;;  %v1683_v35 = vsub.f32 %v1650_v7, %v1667_v47  ;;  %v1489_v21 = vmul.f32 1.442695, %v1460_v15  ;;  %v1347_v33 = vld [vmem:[#allocation5 + $0x70] sm:$0xff]  ;;  %v1365_v15 = vld [vmem:[#allocation5 + $0xf8] sm:$0xff] }
 0x377   : > { %v2537_v23 = vpop.eup %2536  ;;  %v1633_v43 = vmul.f32 %v3553_v40, %v1389_v42  ;;  %2552 = vpow2.f32 %v1569_v51  ;;  %v2005_v25 = vsub.f32 %v3458_v5, %v3507_v39  ;;  %v1573_v27 = vmul.f32 1.442695, %v3556_v16  ;;  %v1348_v51 = vld [vmem:[#allocation5 + $0x78] sm:$0xff] }
 0x378   : > { %v3558_v18 = vpop.eup %2538  ;;  %v1585_v56 = vsub.f32 %v2537_v23, %v3504_v38  ;;  %2554 = vpow2.f32 %v1487_v44  ;;  %v1699_v39 = vsub.f32 0.0, %v1683_v35  ;;  %v1461_v46 = vsub.f32 %v1347_v33, %v1364_v53 }
 0x379   : > { %v2541_v11 = vpop.eup %2540  ;;  %v1506_v50 = vmax.f32 %v3351_v63, %v3558_v18  ;;  %v1649_v10 = vmin.f32 %v1617_v1, %v1633_v43  ;;  %v1619_v58 = vmul.f32 %v3558_v18, %v1391_v8  ;;  %2556 = vpow2.f32 %v1571_v55 }
 0x37a   : > { %v2280_v36 = vadd.f32 -1.0, %v1585_v56  ;;  %v1587_v2 = vsub.f32 %v2541_v11, %v3511_v54  ;;  %v1392_v54 = vld [vmem:[%s3908_s2 + $0x48] sm:$0xff]  ;;  %2558 = vpow2.f32 %v1489_v21  ;;  %v3594_v23 = vsub.f32 %v1381_v28, %v1347_v33  ;;  %v1382_v56 = vld [vmem:[#allocation5 + $0x178] sm:$0xff] }
 0x37b   : > { %v3569_v38 = vpop.eup %2542  ;;  %v3574_v34 = vmin.f32 %v3355_v13, %v1506_v50  ;;  %2560 = vpow2.f32 %v1573_v27  ;;  %v2004_v55 = vsub.f32 %v3541_v37, %v3553_v40  ;;  %v1715_v50 = vmul.f32 %v1699_v39, %v3337_v30  ;;  %v1394_v37 = vld [vmem:[%s3908_s2 + $0x58] sm:$0xff] }
 0x37c   : > { %v2545_v29 = vpop.eup %2544  ;;  %v1666_v32 = vmul.f32 %v2280_v36, %v3358_v52  ;;  %v2282_v0 = vadd.f32 -1.0, %v1587_v2  ;;  %v1507_v5 = vmax.f32 %v3351_v63, %v3569_v38  ;;  %v1620_v7 = vmul.f32 %v3569_v38, %v1392_v54 }
 0x37d   : > { %v1635_v59 = vmul.f32 %v3574_v34, %v1391_v8  ;;  %v1588_v3 = vsub.f32 %v2545_v29, %v3527_v48  ;;  %v3598_v8 = vand.u32 2147483647, %v2005_v25  ;;  %v1462_v2 = vsub.f32 %v1348_v51, %v1365_v15 }
 0x37e   : > { %v1682_v45 = vsub.f32 %v1649_v10, %v1666_v32  ;;  %v1668_v57 = vmul.f32 %v2282_v0, %v3358_v52  ;;  %v3588_v42 = vmin.f32 %v3355_v13, %v1507_v5  ;;  %v3590_v47 = vpop.eup %2546  ;;  %v1393_v10 = vld [vmem:[%s3908_s2 + $0x50] sm:$0xff]  ;;  %v1491_v40 = vmul.f32 1.442695, %v1461_v46 }
 0x37f   : > { %v1651_v20 = vmin.f32 %v1619_v58, %v1635_v59  ;;  %v2283_v4 = vadd.f32 -1.0, %v1588_v3  ;;  %v2549_v1 = vpop.eup %2548  ;;  %v1508_v25 = vmax.f32 %v3351_v63, %v3590_v47  ;;  %v3614_v30 = vsub.f32 %v1382_v56, %v1348_v51 }
 0x380   : > { %v1698_v48 = vsub.f32 0.0, %v1682_v45  ;;  %v1636_v44 = vmul.f32 %v3588_v42, %v1392_v54  ;;  %v3596_v43 = vpop.eup %2550  ;;  %v1589_v27 = vsub.f32 %v2549_v1, %v3535_v26  ;;  %v1575_v32 = vmul.f32 1.442695, %v3594_v23 }
 0x381   : > { %v1684_v11 = vsub.f32 %v1651_v20, %v1668_v57  ;;  %v1669_v35 = vmul.f32 %v2283_v4, %v3358_v52  ;;  %v2553_v58 = vpop.eup %2552  ;;  %v1509_v29 = vmax.f32 %v3351_v63, %v3596_v43  ;;  %v2020_v0 = vand.u32 2147483647, %v2004_v55 }
 0x382   : > { %v1714_v21 = vmul.f32 %v1698_v48, %v3346_v60  ;;  %v1652_v36 = vmin.f32 %v1620_v7, %v1636_v44  ;;  %v3616_v60 = vpop.eup %2554  ;;  %v3622_v26 = vmin.f32 %v3355_v13, %v1508_v25  ;;  %v2284_v54 = vadd.f32 -1.0, %v1589_v27  ;;  %v1395_v7 = vld [vmem:[%s3908_s2 + $0x60] sm:$0xff] }
 0x383   : > { %v1700_v33 = vsub.f32 0.0, %v1684_v11  ;;  %v1621_v5 = vmul.f32 %v3590_v47, %v1393_v10  ;;  %v2557_v39 = vpop.eup %2556  ;;  %v3626_v59 = vmin.f32 %v3355_v13, %v1509_v29  ;;  %v1590_v3 = vsub.f32 %v2553_v58, %v3538_v17 }
 0x384   : > { %v1685_v53 = vsub.f32 %v1652_v36, %v1669_v35  ;;  %1756 = vperm.xlu1 %2505, %v1714_v21   ;;  %v1622_v28 = vmul.f32 %v3596_v43, %v1394_v37  ;;  %v1493_v45 = vmul.f32 1.442695, %v1462_v2  ;;  %v3630_v57 = vpop.eup %2558  ;;  %v1637_v20 = vmul.f32 %v3622_v26, %v1393_v10  ;;  %v1396_v35 = vld [vmem:[%s3908_s2 + $0x68] sm:$0xff] }
 0x385   : > { %v1670_v4 = vmul.f32 %v2284_v54, %v3358_v52  ;;  %v1510_v51 = vmax.f32 %v3351_v63, %v3616_v60  ;;  %v1716_v15 = vmul.f32 %v1700_v33, %v3366_v12  ;;  %v2285_v17 = vadd.f32 -1.0, %v1590_v3  ;;  %v2561_v44 = vpop.eup %2560 }
 0x386   : > { %v1701_v46 = vsub.f32 0.0, %v1685_v53  ;;  %v1638_v1 = vmul.f32 %v3626_v59, %v1394_v37  ;;  %v1577_v48 = vmul.f32 1.442695, %v3614_v30  ;;  %vm2036_vm9 = vcmp.gt.f32.partialorder %v2020_v0, 1e-06 }
 0x387   : > { %v1653_v56 = vmin.f32 %v1621_v5, %v1637_v20  ;;  %v3643_v55 = vmin.f32 %v3355_v13, %v1510_v51  ;;  %v1591_v11 = vsub.f32 %v2557_v39, %v3549_v62  ;;  %v1671_v12 = vmul.f32 %v2285_v17, %v3358_v52 }
 0x388   : > { %1761 = vperm.xlu1 %2505, %v1715_v50   ;;  %v1654_v21 = vmin.f32 %v1622_v28, %v1638_v1  ;;  %v1623_v36 = vmul.f32 %v3616_v60, %v1395_v7  ;;  %v1511_v50 = vmax.f32 %v3351_v63, %v3630_v57  ;;  %v1717_v10 = vmul.f32 %v1701_v46, %v3381_v41 }
 0x389   : > { %v1686_v2 = vsub.f32 %v1653_v56, %v1670_v4  ;;  %v2286_v58 = vadd.f32 -1.0, %v1591_v11  ;;  %v1639_v25 = vmul.f32 %v3643_v55, %v1395_v7  ;;  %v1592_v37 = vsub.f32 %v2561_v44, %v3556_v16 }
 0x38a   : > { %v1687_v27 = vsub.f32 %v1654_v21, %v1671_v12  ;;  %v3656_v62 = vmin.f32 %v3355_v13, %v1511_v50  ;;  %v1624_v33 = vmul.f32 %v3630_v57, %v1396_v35  ;;  %2562 = vpow2.f32 %v1491_v40  ;;  %v1423_v50 = vld [vmem:[%s3910_s4 + $0x40] sm:$0xff] }
 0x38b   : > { %v1702_v53 = vsub.f32 0.0, %v1686_v2  ;;  %v1655_v29 = vmin.f32 %v1623_v36, %v1639_v25  ;;  %v1672_v54 = vmul.f32 %v2286_v58, %v3358_v52  ;;  %v2287_v41 = vadd.f32 -1.0, %v1592_v37 }
 0x38c   : > { %1766 = vperm.xlu1 %2505, %v1716_v15   ;;  %v1703_v5 = vsub.f32 0.0, %v1687_v27  ;;  %v1640_v39 = vmul.f32 %v3656_v62, %v1396_v35  ;;  %2564 = vpow2.f32 %v1575_v32  ;;  %v2006_v3 = vsub.f32 %v3558_v18, %v3574_v34  ;;  %v1421_v32 = vld [vmem:[%s3910_s4 + $0x30] sm:$0xff]  ;;  %v1422_v15 = vld [vmem:[%s3910_s4 + $0x38] sm:$0xff] }
 0x38d   : > { %v1718_v28 = vmul.f32 %v1702_v53, %v3398_v61  ;;  %v1688_v46 = vsub.f32 %v1655_v29, %v1672_v54  ;;  %2566 = vpow2.f32 %v1493_v45  ;;  %v1673_v4 = vmul.f32 %v2287_v41, %v3358_v52 }
 0x38e   : > { %v1719_v16 = vmul.f32 %v1703_v5, %v3448_v49  ;;  %v1656_v20 = vmin.f32 %v1624_v33, %v1640_v39  ;;  %2568 = vpow2.f32 %v1577_v48  ;;  %v2296_v18 = vsel %vm2036_vm9, 1.0, %v2650_v6 }
 0x38f   : > { %v1704_v40 = vsub.f32 0.0, %v1688_v46  ;;  %1776 = vperm.xlu0 %2504, %v1718_v28   ;;  %vm2037_vm10 = vcmp.gt.f32.partialorder %v3598_v8, 1e-06  ;;  %v2022_v61 = vand.u32 2147483647, %v2006_v3  ;;  %v2007_v49 = vsub.f32 %v3569_v38, %v3588_v42 }
 0x390   : > { %1771 = vperm.xlu1 %2505, %v1717_v10   ;;  %v1689_v34 = vsub.f32 %v1656_v20, %v1673_v4  ;;  %v2084_v51 = vmul.f32 %v2296_v18, %v1421_v32  ;;  %v2297_v0 = vsel %vm2037_vm10, 1.0, %v2650_v6  ;;  %v2008_v38 = vsub.f32 %v3590_v47, %v3622_v26  ;;  %v1398_v47 = vld [vmem:[%s3908_s2 + $0x78] sm:$0xff] }
 0x391   : > { %v1720_v45 = vmul.f32 %v1704_v40, %v3468_v14  ;;  %vm2038_vm11 = vcmp.gt.f32.partialorder %v2022_v61, 1e-06  ;;  %v2023_v8 = vand.u32 2147483647, %v2007_v49  ;;  %v1397_v14 = vld [vmem:[%s3908_s2 + $0x70] sm:$0xff]  ;;  %v2085_v56 = vmul.f32 %v2297_v0, %v1422_v15 }
 0x392   : > { %v1705_v7 = vsub.f32 0.0, %v1689_v34  ;;  %v2298_v35 = vsel %vm2038_vm11, 1.0, %v2650_v6  ;;  %v2009_v58 = vsub.f32 %v3596_v43, %v3626_v59  ;;  %v2011_v40 = vsub.f32 %v3630_v57, %v3656_v62 }
 0x393   : > { %1786 = vperm.xlu0 %2504, %v1720_v45   ;;  %vm2039_vm12 = vcmp.gt.f32.partialorder %v2023_v8, 1e-06  ;;  %v2107_v29 = vsel %vm409_vm1, %v2085_v56, 0.0  ;;  %v2086_v54 = vmul.f32 %v2298_v35, %v1423_v50  ;;  %v1430_v50 = vld [vmem:[%s3910_s4 + $0x78] sm:$0xff]  ;;  %vm2134_vm4 = vcmp.eq.s32.totalorder %v3051_v31, 0 }
 0x394   : > { %1781 = vperm.xlu1 %2505, %v1719_v16   ;;  %v1721_v17 = vmul.f32 %v1705_v7, %v3488_v9  ;;  %v3681_v1 = vpop.eup %2562  ;;  %v2105_v9 = vsel %vm409_vm1, %v2084_v51, 0.0  ;;  %v2025_v3 = vand.u32 2147483647, %v2009_v58  ;;  %v1426_v7 = vld [vmem:[%s3910_s4 + $0x58] sm:$0xff]  ;;  %vm2136_vm5 = vcmp.eq.s32.totalorder %v3051_v31, 1 }
 0x395   : > { %v1512_v48 = vmax.f32 %v3351_v63, %v3681_v1  ;;  %v1625_v12 = vmul.f32 %v3681_v1, %v1397_v14  ;;  %v2106_v33 = vadd.f32 %v2105_v9, %v3529_v24  ;;  %v2010_v24 = vsub.f32 %v3616_v60, %v3643_v55 }
 0x396   : > { %v2565_v42 = vpop.eup %2564  ;;  %v2109_v4 = vsel %vm409_vm1, %v2086_v54, 0.0  ;;  %vm2041_vm14 = vcmp.gt.f32.partialorder %v2025_v3, 1e-06 }
 0x397   : > { %v3690_v44 = vpop.eup %2566  ;;  %v1593_v11 = vsub.f32 %v2565_v42, %v3594_v23  ;;  %v1529_v21 = vmin.f32 %v3355_v13, %v1512_v48  ;;  %v2024_v23 = vand.u32 2147483647, %v2008_v38  ;;  %v2108_v28 = vadd.f32 %v2107_v29, %v2106_v33  ;;  %v1428_v48 = vld [vmem:[%s3910_s4 + $0x68] sm:$0xff] }
 0x398   : > { %1791 = vperm.xlu1 %2505, %v1721_v17   ;;  %v2569_v26 = vpop.eup %2568  ;;  %v1513_v36 = vmax.f32 %v3351_v63, %v3690_v44  ;;  %v1626_v37 = vmul.f32 %v3690_v44, %v1398_v47  ;;  %v2026_v60 = vand.u32 2147483647, %v2010_v24  ;;  %v2301_v57 = vsel %vm2041_vm14, 1.0, %v2650_v6  ;;  %v1433_v24 = vld [vmem:[%s3911_s5 + $0x10] sm:$0xff] }
 0x399   : > { %v2288_v10 = vadd.f32 -1.0, %v1593_v11  ;;  %v1594_v2 = vsub.f32 %v2569_v26, %v3614_v30  ;;  %v1641_v25 = vmul.f32 %v1529_v21, %v1397_v14  ;;  %v2299_v30 = vsel %vm2039_vm12, 1.0, %v2650_v6 }
 0x39a   : > { %v1530_v27 = vmin.f32 %v3355_v13, %v1513_v36  ;;  %vm2040_vm13 = vcmp.gt.f32.partialorder %v2024_v23, 1e-06  ;;  %v1424_v13 = vld [vmem:[%s3910_s4 + $0x48] sm:$0xff]  ;;  %v2110_v55 = vadd.f32 %v2109_v4, %v2108_v28  ;;  %v2012_v62 = vsub.f32 %v3681_v1, %v1529_v21 }
 0x39b   : > { %v1674_v63 = vmul.f32 %v2288_v10, %v3358_v52  ;;  %v2289_v53 = vadd.f32 -1.0, %v1594_v2  ;;  %v1657_v5 = vmin.f32 %v1625_v12, %v1641_v25  ;;  %v2087_v20 = vmul.f32 %v2299_v30, %v1424_v13  ;;  %v1432_v30 = vld [vmem:[%s3911_s5 + $0x8] sm:$0xff] }
 0x39c   : > { %v1642_v41 = vmul.f32 %v1530_v27, %v1398_v47  ;;  %v2300_v32 = vsel %vm2040_vm13, 1.0, %v2650_v6  ;;  %vm2042_vm15 = vcmp.gt.f32.partialorder %v2026_v60, 1e-06  ;;  %v2089_v15 = vmul.f32 %v2301_v57, %v1426_v7 }
 0x39d   : > { %v1675_v43 = vmul.f32 %v2289_v53, %v3358_v52  ;;  %v1690_v59 = vsub.f32 %v1657_v5, %v1674_v63  ;;  %v1425_v52 = vld [vmem:[%s3910_s4 + $0x50] sm:$0xff]  ;;  %v2111_v45 = vsel %vm409_vm1, %v2087_v20, 0.0  ;;  %v2302_v17 = vsel %vm2042_vm15, 1.0, %v2650_v6 }
 0x39e   : > { %v1658_v39 = vmin.f32 %v1626_v37, %v1642_v41  ;;  %v2088_v49 = vmul.f32 %v2300_v32, %v1425_v52  ;;  %v2112_v51 = vadd.f32 %v2111_v45, %v2110_v55  ;;  %v2013_v8 = vsub.f32 %v3690_v44, %v1530_v27  ;;  %v1429_v44 = vld [vmem:[%s3910_s4 + $0x70] sm:$0xff]  ;;  %v1436_v45 = vld [vmem:[%s3911_s5 + $0x28] sm:$0xff] }
 0x39f   : > { %v1706_v46 = vsub.f32 0.0, %v1690_v59  ;;  %v2028_v38 = vand.u32 2147483647, %v2012_v62  ;;  %v2115_v1 = vsel %vm409_vm1, %v2089_v15, 0.0 }
 0x3a0   : > { %v1691_v16 = vsub.f32 %v1658_v39, %v1675_v43  ;;  %v2113_v0 = vsel %vm409_vm1, %v2088_v49, 0.0  ;;  %v2029_v9 = vand.u32 2147483647, %v2013_v8 }
 0x3a1   : > { %v1722_v18 = vmul.f32 %v1706_v46, %v3501_v19  ;;  %v2027_v19 = vand.u32 2147483647, %v2011_v40  ;;  %v2114_v14 = vadd.f32 %v2113_v0, %v2112_v51  ;;  %vm2044_vm2 = vcmp.gt.f32.partialorder %v2028_v38, 1e-06  ;;  %v1437_v0 = vld [vmem:[%s3911_s5 + $0x30] sm:$0xff]  ;;  %v1438_v38 = vld [vmem:[%s3911_s5 + $0x38] sm:$0xff] }
 0x3a2   : > { %v1707_v34 = vsub.f32 0.0, %v1691_v16  ;;  %v2304_v35 = vsel %vm2044_vm2, 1.0, %v2650_v6  ;;  %vm2045_vm3 = vcmp.gt.f32.partialorder %v2029_v9, 1e-06  ;;  %v1434_v16 = vld [vmem:[%s3911_s5 + $0x18] sm:$0xff]  ;;  %v1439_v9 = vld [vmem:[%s3911_s5 + $0x40] sm:$0xff] }
 0x3a3   : > { %1796 = vperm.xlu0 %2504, %v1722_v18   ;;  %vm2043_vm0 = vcmp.gt.f32.partialorder %v2027_v19, 1e-06  ;;  %v2116_v11 = vadd.f32 %v2115_v1, %v2114_v14  ;;  %v2092_v12 = vmul.f32 %v2304_v35, %v1429_v44  ;;  %v2305_v23 = vsel %vm2045_vm3, 1.0, %v2650_v6  ;;  %v1435_v18 = vld [vmem:[%s3911_s5 + $0x20] sm:$0xff] }
 0x3a4   : > { %v1723_v61 = vmul.f32 %v1707_v34, %v3525_v22  ;;  %v1427_v22 = vld [vmem:[%s3910_s4 + $0x60] sm:$0xff]  ;;  %v2303_v56 = vsel %vm2043_vm0, 1.0, %v2650_v6  ;;  %v2093_v2 = vmul.f32 %v2305_v23, %v1430_v50  ;;  %v3807_v50 = vld [vmem:[%s3911_s5 + $0x58] sm:$0xff] }
 0x3a5   : > { %v2090_v42 = vmul.f32 %v2302_v17, %v1427_v22  ;;  %v2091_v47 = vmul.f32 %v2303_v56, %v1428_v48  ;;  %v2121_v58 = vsel %vm409_vm1, %v2092_v12, 0.0  ;;  %v1431_v6 = vld [vmem:[%s3911_s5] sm:$0xff]  ;;  %v3801_v12 = vld [vmem:[%s3911_s5 + $0x50] sm:$0xff] }
 0x3a6   : > { %1801 = vperm.xlu1 %2505, %v1723_v61   ;;  %v1861_v25 = vpop.permute.xlu0 %1860  ;;  %v2123_v37 = vsel %vm409_vm1, %v2093_v2, 0.0  ;;  %v1871_v54 = vpop.permute.xlu1 %1870 }
 0x3a7   : > { %v2117_v26 = vsel %vm409_vm1, %v2090_v42, 0.0  ;;  %v2119_v36 = vsel %vm409_vm1, %v2091_v47, 0.0  ;;  %v1938_v13 = vmul.f32 %v1861_v25, %v1431_v6  ;;  %vm1820_vm1 = vcmask 15360   ;;  %v3795_v47 = vld [vmem:[%s3911_s5 + $0x48] sm:$0xff] }
 0x3a8   : > { %v2118_v21 = vadd.f32 %v2117_v26, %v2116_v11  ;;  %v1940_v3 = vmul.f32 %v1871_v54, %v1433_v24  ;;  %v3821_v54 = vld [vmem:[%s3911_s5 + $0x68] sm:$0xff] }
 0x3a9   : > { %v1954_v28 = vsel %vm1820_vm1, %v1938_v13, 0.0 }
 0x3aa   : > { %v2120_v10 = vadd.f32 %v2119_v36, %v2118_v21  ;;  %v1866_v63 = vpop.permute.xlu0 %1865  ;;  %v1876_v41 = vpop.permute.xlu1 %1875  ;;  %v1957_v40 = vsel %vm1820_vm1, %v1940_v3, 0.0 }
 0x3ab   : > { %v1939_v59 = vmul.f32 %v1866_v63, %v1432_v30  ;;  %v1941_v32 = vmul.f32 %v1876_v41, %v1434_v16 }
 0x3ac   : > { %v2122_v27 = vadd.f32 %v2121_v58, %v2120_v10 }
 0x3ad   : > { %v1955_v46 = vsel %vm1820_vm1, %v1939_v59, 0.0  ;;  %v1959_v61 = vsel %vm1820_vm1, %v1941_v32, 0.0  ;;  %v3830_v59 = vld [vmem:[%s3911_s5 + $0x70] sm:$0xff] }
 0x3ae   : > { %v2124_v33 = vadd.f32 %v2123_v37, %v2122_v27  ;;  %v1881_v53 = vpop.permute.xlu0 %1880  ;;  %v1886_v39 = vpop.permute.xlu1 %1885  ;;  %v1956_v52 = vadd.f32 %v1955_v46, %v1954_v28  ;;  %v3814_v37 = vld [vmem:[%s3911_s5 + $0x60] sm:$0xff] }
 0x3af   : > { %v1942_v49 = vmul.f32 %v1881_v53, %v1435_v18  ;;  %v1943_v57 = vmul.f32 %v1886_v39, %v1436_v45 }
 0x3b0   : > { %v1958_v60 = vadd.f32 %v1957_v40, %v1956_v52 }
 0x3b1   : > { %v1961_v62 = vsel %vm1820_vm1, %v1942_v49, 0.0  ;;  %v1963_v22 = vsel %vm1820_vm1, %v1943_v57, 0.0 }
 0x3b2   : > { %v1891_v29 = vpop.permute.xlu0 %1890  ;;  %v1896_v4 = vpop.permute.xlu1 %1895  ;;  %v1960_v7 = vadd.f32 %v1959_v61, %v1958_v60 }
 0x3b3   : > { %v1944_v17 = vmul.f32 %v1891_v29, %v1437_v0  ;;  %v1945_v1 = vmul.f32 %v1896_v4, %v1438_v38  ;;  %v3838_v4 = vld [vmem:[%s3911_s5 + $0x78] sm:$0xff] }
 0x3b4   : > { %v1962_v15 = vadd.f32 %v1961_v62, %v1960_v7 }
 0x3b5   : > { %v1965_v48 = vsel %vm1820_vm1, %v1944_v17, 0.0  ;;  %v1967_v44 = vsel %vm1820_vm1, %v1945_v1, 0.0 }
 0x3b6   : > { %v1901_v5 = vpop.permute.xlu0 %1900  ;;  %v1964_v14 = vadd.f32 %v1963_v22, %v1962_v15 }
 0x3b7   : > { %v1946_v35 = vmul.f32 %v1901_v5, %v1439_v9 }
 0x3b8   : > { %v1966_v56 = vadd.f32 %v1965_v48, %v1964_v14 }
 0x3b9   : > { %v1969_v23 = vsel %vm1820_vm1, %v1946_v35, 0.0 }
 0x3ba   : > { %v1968_v21 = vadd.f32 %v1967_v44, %v1966_v56 }
 0x3bc   : > { %v1970_v58 = vadd.f32 %v1969_v23, %v1968_v21 }
 0x3c2   : > { %2125 = vadd.xlane.f32.xlu0 %v2124_v33 }
 0x3c7   : > { %v1906_v43 = vpop.permute.xlu0 %1905 }
 0x3c8   : > { %v1947_v36 = vmul.f32 %v1906_v43, %v3795_v47 }
 0x3ca   : > { %v1971_v63 = vsel %vm1820_vm1, %v1947_v36, 0.0 }
 0x3cb   : > { %v1911_v20 = vpop.permute.xlu0 %1910 }
 0x3cc   : > { %v1948_v10 = vmul.f32 %v1911_v20, %v3801_v12 }
 0x3ce   : > { %v1973_v5 = vsel %vm1820_vm1, %v1948_v10, 0.0 }
 0x3dd   : > { %v1727_v55 = vpop.permute.xlu0 %1726 }
 0x3de   : > { %v1804_v27 = vmul.f32 %v1727_v55, %v1431_v6  ;;  %v1972_v6 = vadd.f32 %v1971_v63, %v1970_v58 }
 0x3e0   : > { %v1821_v43 = vsel %vm1820_vm1, %v1804_v27, 0.0  ;;  %v1974_v28 = vadd.f32 %v1973_v5, %v1972_v6 }
 0x3e1   : > { %v1916_v51 = vpop.permute.xlu0 %1915 }
 0x3e2   : > { %v1949_v53 = vmul.f32 %v1916_v51, %v3807_v50 }
 0x3e4   : > { %v1975_v39 = vsel %vm1820_vm1, %v1949_v53, 0.0 }
 0x3e5   : > { %v1732_v34 = vpop.permute.xlu1 %1731  ;;  %v1921_v42 = vpop.permute.xlu0 %1920 }
 0x3e6   : > { %v1805_v25 = vmul.f32 %v1732_v34, %v1432_v30  ;;  %v1950_v41 = vmul.f32 %v1921_v42, %v3814_v37  ;;  %v1976_v34 = vadd.f32 %v1975_v39, %v1974_v28 }
 0x3e8   : > { %v1822_v30 = vsel %vm1820_vm1, %v1805_v25, 0.0  ;;  %v1977_v40 = vsel %vm1820_vm1, %v1950_v41, 0.0 }
 0x3e9   : > { %v1737_v19 = vpop.permute.xlu1 %1736  ;;  %v1926_v26 = vpop.permute.xlu0 %1925  ;;  %v1823_v52 = vadd.f32 %v1822_v30, %v1821_v43  ;;  %v1978_v57 = vadd.f32 %v1977_v40, %v1976_v34 }
 0x3ea   : > { %v1806_v29 = vmul.f32 %v1737_v19, %v1433_v24  ;;  %v1951_v24 = vmul.f32 %v1926_v26, %v3821_v54 }
 0x3ec   : > { %v1824_v46 = vsel %vm1820_vm1, %v1806_v29, 0.0  ;;  %v1979_v49 = vsel %vm1820_vm1, %v1951_v24, 0.0 }
 0x3ed   : > { %v1742_v8 = vpop.permute.xlu1 %1741  ;;  %v1931_v33 = vpop.permute.xlu0 %1930  ;;  %v1825_v61 = vadd.f32 %v1824_v46, %v1823_v52  ;;  %v1980_v22 = vadd.f32 %v1979_v49, %v1978_v57 }
 0x3ee   : > { %v1807_v13 = vmul.f32 %v1742_v8, %v1434_v16  ;;  %v1952_v32 = vmul.f32 %v1931_v33, %v3830_v59 }
 0x3f0   : > { %v1826_v60 = vsel %vm1820_vm1, %v1807_v13, 0.0  ;;  %v1981_v15 = vsel %vm1820_vm1, %v1952_v32, 0.0 }
 0x3f1   : > { %v1747_v11 = vpop.permute.xlu1 %1746  ;;  %v1936_v16 = vpop.permute.xlu0 %1935  ;;  %v1827_v51 = vadd.f32 %v1826_v60, %v1825_v61  ;;  %v1982_v1 = vadd.f32 %v1981_v15, %v1980_v22 }
 0x3f2   : > { %v1808_v20 = vmul.f32 %v1747_v11, %v1435_v18  ;;  %v1953_v18 = vmul.f32 %v1936_v16, %v3838_v4 }
 0x3f4   : > { %v1828_v62 = vsel %vm1820_vm1, %v1808_v20, 0.0 }
 0x3f5   : > { %v1752_v2 = vpop.permute.xlu1 %1751  ;;  %v1829_v14 = vadd.f32 %v1828_v62, %v1827_v51 }
 0x3f6   : > { %v1809_v55 = vmul.f32 %v1752_v2, %v1436_v45  ;;  %v1983_v45 = vsel %vm1820_vm1, %v1953_v18, 0.0 }
 0x3f7   : > { %v1984_v26 = vadd.f32 %v1983_v45, %v1982_v1 }
 0x3f8   : > { %v1830_v17 = vsel %vm1820_vm1, %v1809_v55, 0.0 }
 0x3f9   : > { %v1831_v11 = vadd.f32 %v1830_v17, %v1829_v14  ;;  %v1985_v10 = vrot.slane %v1984_v26, 4 }
 0x3fb   : > { %v1986_v33 = vadd.f32 %v1985_v10, %v1984_v26 }
 0x3fd   : > { %v1987_v41 = vrot.slane %v1986_v33, 2 }
 0x3ff   : > { %v1988_v13 = vadd.f32 %v1987_v41, %v1986_v33 }
 0x403   : > { %v1757_v3 = vpop.permute.xlu1 %1756 }
 0x404   : > { %v1810_v19 = vmul.f32 %v1757_v3, %v1437_v0  ;;  %v1989_v3 = vrot.slane %v1988_v13, 1 }
 0x406   : > { %v1832_v48 = vsel %vm1820_vm1, %v1810_v19, 0.0  ;;  %v1990_v20 = vadd.f32 %v1989_v3, %v1988_v13 }
 0x407   : > { %v1762_v7 = vpop.permute.xlu1 %1761  ;;  %v1833_v0 = vadd.f32 %v1832_v48, %v1831_v11 }
 0x408   : > { %v1811_v8 = vmul.f32 %v1762_v7, %v1438_v38  ;;  %v1991_v34 = vmax.f32 %v1990_v20, 1.0 }
 0x40a   : > { %v1834_v44 = vsel %vm1820_vm1, %v1811_v8, 0.0  ;;  %2570 = vrcp.f32 %v1991_v34 }
 0x40b   : > { %v1767_v42 = vpop.permute.xlu1 %1766  ;;  %v1835_v23 = vadd.f32 %v1834_v44, %v1833_v0 }
 0x40c   : > { %v1812_v56 = vmul.f32 %v1767_v42, %v1439_v9 }
 0x40e   : > { %v1836_v21 = vsel %vm1820_vm1, %v1812_v56, 0.0  ;;  %v1777_v38 = vpop.permute.xlu0 %1776 }
 0x40f   : > { %v1772_v35 = vpop.permute.xlu1 %1771  ;;  %v1837_v58 = vadd.f32 %v1836_v21, %v1835_v23  ;;  %v1814_v27 = vmul.f32 %v1777_v38, %v3801_v12 }
 0x410   : > { %v1813_v36 = vmul.f32 %v1772_v35, %v3795_v47 }
 0x411   : > { %v1840_v53 = vsel %vm1820_vm1, %v1814_v27, 0.0 }
 0x412   : > { %v1838_v2 = vsel %vm1820_vm1, %v1813_v36, 0.0  ;;  %v1787_v29 = vpop.permute.xlu0 %1786 }
 0x413   : > { %v1782_v25 = vpop.permute.xlu1 %1781  ;;  %v1839_v9 = vadd.f32 %v1838_v2, %v1837_v58  ;;  %v1816_v30 = vmul.f32 %v1787_v29, %v3814_v37 }
 0x414   : > { %v1815_v63 = vmul.f32 %v1782_v25, %v3807_v50  ;;  %v2571_v62 = vpop.eup %2570 }
 0x415   : > { %v1841_v5 = vadd.f32 %v1840_v53, %v1839_v9  ;;  %v1844_v12 = vsel %vm1820_vm1, %v1816_v30, 0.0 }
 0x416   : > { %v1842_v47 = vsel %vm1820_vm1, %v1815_v63, 0.0 }
 0x417   : > { %v1792_v6 = vpop.permute.xlu1 %1791  ;;  %v1843_v43 = vadd.f32 %v1842_v47, %v1841_v5 }
 0x418   : > { %v1817_v39 = vmul.f32 %v1792_v6, %v3821_v54 }
 0x419   : > { %v1845_v24 = vadd.f32 %v1844_v12, %v1843_v43 }
 0x41a   : > { %v1846_v50 = vsel %vm1820_vm1, %v1817_v39, 0.0 }
 0x41b   : > { %v1847_v46 = vadd.f32 %v1846_v50, %v1845_v24 }
 0x422   : > { %v1797_v28 = vpop.permute.xlu0 %1796 }
 0x423   : > { %v1818_v16 = vmul.f32 %v1797_v28, %v3830_v59 }
 0x425   : > { %v1802_v52 = vpop.permute.xlu1 %1801  ;;  %v1848_v40 = vsel %vm1820_vm1, %v1818_v16, 0.0 }
 0x426   : > { %v1819_v37 = vmul.f32 %v1802_v52, %v3838_v4  ;;  %v1849_v32 = vadd.f32 %v1848_v40, %v1847_v46 }
 0x428   : > { %v1850_v54 = vsel %vm1820_vm1, %v1819_v37, 0.0 }
 0x429   : > { %v1851_v60 = vadd.f32 %v1850_v54, %v1849_v32 }
 0x42b   : > { %v1852_v55 = vrot.slane %v1851_v60, 4 }
 0x42d   : > { %v1853_v61 = vadd.f32 %v1852_v55, %v1851_v60 }
 0x42f   : > { %v1854_v49 = vrot.slane %v1853_v61, 2 }
 0x431   : > { %v1855_v18 = vadd.f32 %v1854_v49, %v1853_v61 }
 0x433   : > { %v1856_v7 = vrot.slane %v1855_v18, 1 }
 0x435   : > { %v1857_v57 = vadd.f32 %v1856_v7, %v1855_v18 }
 0x437   : > { %v1993_v19 = vmul.f32 %v2571_v62, %v1857_v57 }
 0x439   : > { %v1994_v59 = vsel %vm1820_vm1, %v1993_v19, 0.0 }
 0x43a   : > { %1995 = vadd.xlane.f32.xlu1 %v1994_v59 }
 0x44f   : > { %v2126_v51 = vpop.xlane.xlu0 %2125 }
 0x450   : > { %v2127_v15 = vrot.slane %v2126_v51, 4 }
 0x452   : > { %v2128_v4 = vadd.f32 %v2127_v15, %v2126_v51 }
 0x454   : > { %v2129_v22 = vrot.slane %v2128_v4, 2 }
 0x456   : > { %v2130_v17 = vadd.f32 %v2129_v22, %v2128_v4 }
 0x458   : > { %v2131_v8 = vrot.slane %v2130_v17, 1 }
 0x45a   : > { %v2132_v14 = vadd.f32 %v2131_v8, %v2130_v17 }
 0x45c   : > { %2347 = vpush %v2132_v14 }
 0x48d   : > { %s2348_s15 = spop %2347 }
 0x48e   : > { %v2137_v1 = vstv %s2348_s15 }
 0x4c7   : > { %v1996_v45 = vpop.xlane.xlu1 %1995 }
 0x4c8   : > { %v1997_v42 = vmul.f32 0.5, %v1996_v45 }
 0x4ca   : > { %v2135_v48 = vsel %vm2134_vm4, %v1997_v42, 0.0 }
 0x4cb   : > { %v2138_v56 = vsel %vm2136_vm5, %v2137_v1, %v2135_v48 }
 0x4cc   : > { %2139 = vst [vmem:[#allocation9] sm:$0x1] %v2138_v56 }
 0x4cd PF: > { %p3871_p3 = scmp.eq.s32.totalorder %s2242_s12, 2  ;;  %s2651_s17 = smov [#allocation9]  }
 0x4ce   : > { %s2147_s18 = sshll.u32 %s2651_s17, 4  ;;  %s2148_s18 = int_to_ptr.vmem [resolvable:$true] %s2147_s18 }
 0x4cf   : > { %s2587_s19 = scalar_lea.vmem %s2148_s18, 16  ;;  %s2593_s20 = scalar_lea.vmem %s2148_s18, 32 }
 0x4d0   : > { %p2588_p4 = scmp.ne.s32.totalorder %s2148_s18, %s2587_s19  ;;  %p2594_p7 = scmp.lt.s32.totalorder %s2148_s18, %s2148_s18 }
 0x4d1   : > { %p2595_p8 = scmp.lt.s32.totalorder %s2593_s20, %s2587_s19 }
 0x4d2   : > { %p2589_p5 = pnand %p2588_p4, %p3871_p3 }
 0x4d3   : > { %p2596_p9 = por %p2595_p8, %p2594_p7 }
 0x4d4   : > { %p2590_p6 = pneg %p2589_p5 }
 0x4d6   : > { %p2597_p10 = pnand %p2596_p9, %p2590_p6 }
 0x4d8   : > { %2600 = shalt.err (!%p2597_p10)
}
 0x4d9   : > { %s2601_s22 = scalar_lea.hbm %s3915_s9, 16 }
 0x4da   : > { %p2602_p11 = scmp.ne.s32.totalorder %s3915_s9, %s2601_s22  ;;  %p2607_p0 = scmp.lt.u32.totalorder %s2601_s22, %s3915_s9 }
 0x4dc   : > { %p2603_p12 = pnand %p2602_p11, %p3871_p3 }
 0x4de   : > { %p2604_p13 = pneg %p2603_p12 }
 0x4e0   : > { %p2609_p1 = pnand %p2607_p0, %p2604_p13 }
 0x4e2   : > { %2612 = shalt.err (!%p2609_p1)
}
 0x4e3   : > { %2354 = dma.vmem_to_hbm [thread:$0]  (%p3871_p3), %s2148_s18, 16, %s3915_s9, [#allocation7]  }
 0x4e4   : > { %2630 = dma.done.wait (%p3871_p3), [#allocation7], 16  }
 0x4e5   : > { %2632 = vsyncadd (%p3871_p3), [#allocation7], 4294967280 }
 0x4e6 PF: > { %s21_s11 = sadd.s32 1, %s2643_s11   ;;  %s3952_s30 = smov %s2639_s10 }
 0x4e7   : > { %p18_p2 = scmp.ge.s32.totalorder %s21_s11, 5   ;;  %s3953_s10 = smov %s3955_s13 }
 0x4e9   :  { %20 = sbr.rel (!%p18_p2) target bundleno = 3 (0x3), region = 109 }
 0x4f0   :  { %2160 = vsyncpa [#allocation7], 1 }
 0x4f1   :  { %2162 = vsyncpa [#allocation7 + $0x1], 1 }
 0x4f2   :  { %2163 = vsyncpa [#allocation8], 1 }
 0x4f3   :  { %2165 = vsyncpa [#allocation8 + $0x1], 1 }

</bundles_post_ra>
